<compile_context>
chip_gen: v7x
topology: tpu7x:2x2x1
jax: 0.10.0
libtpu: 0.0.40
codegen_flags: <defaults>
</compile_context>

<pallas_src>
import jax
import jax.numpy as jnp
from jax.experimental import pallas as pl
from jax.experimental.pallas import tpu as pltpu

# MountainCarContinuous-v0: observation dim = 2, action dim = 1
N_STATES = 2
N_ACTIONS = 1
IN_DIM = N_STATES + N_ACTIONS
H1 = 400
H2 = 300
LEAKY_SLOPE = 0.01  # F.leaky_relu default negative_slope


def _leaky_relu(x):
    # Valid because 0 < slope < 1: mul + max instead of cmp + mul + select.
    return jnp.maximum(x, LEAKY_SLOPE * x)


def _round_up(x, m):
    return ((x + m - 1) // m) * m


def _num_tensorcores():
    """Best-effort TensorCore count (v7x has 2); fall back to 1."""
    try:
        info = pltpu.get_tpu_info()
    except Exception:
        return 1
    for attr in ("tensorcores_per_chip", "num_tensorcores", "num_cores",
                 "cores_per_chip"):
        n = getattr(info, attr, None)
        if isinstance(n, int) and n > 0:
            return n
    return 1


def critic_kernel(x_ref, w1_ref, b1_ref, w2_ref, b2_ref, w3_ref, b3_ref,
                  out_ref):
    # Batch-on-lanes layout: x_ref (3, tb), out_ref (1, tb).
    x = x_ref[...]                         # (3, tb)  f32
    w1 = w1_ref[...]                       # (400, 3) f32

    # --- fc1 (concat already fused into x): K = 3, far too small for the MXU,
    #     so three broadcast outer-products on the VPU.  h^T: (400, tb).
    h = (w1[:, 0:1] * x[0:1, :]
         + w1[:, 1:2] * x[1:2, :]
         + w1[:, 2:3] * x[2:3, :]
         + b1_ref[...])
    h = _leaky_relu(h)

    # --- fc2: the only real matmul, (300,400) @ (400,tb) on the MXU.
    #     bf16 inputs, f32 accumulation.
    h = jnp.dot(w2_ref[...], h.astype(jnp.bfloat16),
                preferred_element_type=jnp.float32)      # (300, tb) f32
    h = _leaky_relu(h + b2_ref[...])

    # --- fc3: N = n_actions = 1 -> VPU multiply + sublane reduction.
    #     b3 comes in as an SMEM scalar.  Output is lane-dense (1, tb).
    q = jnp.sum(h * w3_ref[...], axis=0, keepdims=True) + b3_ref[0, 0]
    out_ref[...] = q.astype(out_ref.dtype)


def critic_forward(s, a, params, *, block_b=1024):
    """s: (B, n_states), a: (B, n_actions) -> (B, n_actions) float32."""
    w1, b1, w2, b2, w3, b3 = params
    assert s.shape[1] == N_STATES and a.shape[1] == N_ACTIONS
    assert N_ACTIONS == 1, "kernel fc3 hard-codes a single Q output"
    B = s.shape[0]

    # Batch-on-lanes layout: transpose activations, transpose weights, column
    # biases.  Only the big weight (w2) goes bf16.
    x_t = jnp.concatenate([s, a], axis=1).T        # (3, B)   f32
    w1_t = w1.T                                    # (400, 3) f32
    b1_t = b1.reshape(H1, 1)                       # (400, 1) f32
    w2_t = w2.T.astype(jnp.bfloat16)               # (300, 400) bf16
    b2_t = b2.reshape(H2, 1)                       # (300, 1) f32
    w3_c = w3.reshape(H2, 1)                       # (300, 1) f32
    b3_s = b3.reshape(1, 1)                        # SMEM scalar

    # Batch tile: multiple of 128 (lane-dense layout).  Large default tile to
    # amortize per-step overhead; on multi-TC chips cap so the "parallel" grid
    # gets at least one step per TensorCore.
    tb = min(block_b, _round_up(B, 128))
    n_cores = _num_tensorcores()
    if n_cores > 1:
        tb = min(tb, _round_up(pl.cdiv(B, n_cores), 128))
    b_pad = _round_up(B, tb)
    if b_pad != B:
        x_t = jnp.pad(x_t, ((0, 0), (0, b_pad - B)))

    flops = 2 * b_pad * (IN_DIM * H1 + H1 * H2 + H2 * N_ACTIONS)
    bytes_accessed = (b_pad * IN_DIM * 4 + b_pad * N_ACTIONS * 4   # x, out
                      + IN_DIM * H1 * 4 + H1 * 4                   # w1, b1
                      + H1 * H2 * 2 + H2 * 4                       # w2(bf16), b2
                      + H2 * 4 + 4)                                # w3, b3

    out = pl.pallas_call(
        critic_kernel,
        out_shape=jax.ShapeDtypeStruct((N_ACTIONS, b_pad), jnp.float32),
        grid=(b_pad // tb,),
        in_specs=[
            # activations: tiled over batch (lane axis)
            pl.BlockSpec((IN_DIM, tb), lambda i: (0, i)),
            # weights/biases: constant block index -> VMEM-resident across steps
            pl.BlockSpec((H1, IN_DIM), lambda i: (0, 0)),
            pl.BlockSpec((H1, 1), lambda i: (0, 0)),
            pl.BlockSpec((H2, H1), lambda i: (0, 0)),
            pl.BlockSpec((H2, 1), lambda i: (0, 0)),
            pl.BlockSpec((H2, 1), lambda i: (0, 0)),
            pl.BlockSpec(memory_space=pltpu.MemorySpace.SMEM),
        ],
        out_specs=pl.BlockSpec((N_ACTIONS, tb), lambda i: (0, i)),
        compiler_params=pltpu.CompilerParams(
            dimension_semantics=("parallel",)),
        cost_estimate=pl.CostEstimate(
            flops=flops, transcendentals=0, bytes_accessed=bytes_accessed),
    )(x_t, w1_t, b1_t, w2_t, b2_t, w3_c, b3_s)

    return out[:, :B].T   # (B, n_actions)


def init_params(key):
    """Deterministic init matching the module: kaiming_normal_ weights, bias=0.001."""
    def kaiming_normal(k, fan_in, fan_out):
        # nn.init.kaiming_normal_ default: gain = sqrt(2), std = gain / sqrt(fan_in)
        std = jnp.sqrt(2.0 / fan_in)
        # PyTorch stores weight as (out, in); generate that then transpose to (in, out).
        w = jax.random.normal(k, (fan_out, fan_in), dtype=jnp.float32) * std
        return w.T

    k1, k2, k3 = jax.random.split(key, 3)
    w1 = kaiming_normal(k1, IN_DIM, H1)
    b1 = jnp.full((1, H1), 0.001, dtype=jnp.float32)
    w2 = kaiming_normal(k2, H1, H2)
    b2 = jnp.full((1, H2), 0.001, dtype=jnp.float32)
    w3 = kaiming_normal(k3, H2, N_ACTIONS)
    b3 = jnp.full((1, N_ACTIONS), 0.001, dtype=jnp.float32)
    return (w1, b1, w2, b2, w3, b3)


def critic_reference(s, a, params):
    """Pure-f32 PyTorch-semantics reference."""
    w1, b1, w2, b2, w3, b3 = params
    hp = jax.lax.Precision.HIGHEST
    x = jnp.concatenate([s, a], axis=1)
    h = _leaky_relu(jnp.dot(x, w1, precision=hp) + b1)
    h = _leaky_relu(jnp.dot(h, w2, precision=hp) + b2)
    return jnp.dot(h, w3, precision=hp) + b3


def critic_reference_matched(s, a, params):
    """Reference mirroring the kernel's mixed-precision recipe (bf16 fc2 only)."""
    w1, b1, w2, b2, w3, b3 = params
    hp = jax.lax.Precision.HIGHEST
    x = jnp.concatenate([s, a], axis=1)
    h = _leaky_relu(jnp.dot(x, w1, precision=hp) + b1)
    h = jnp.dot(h.astype(jnp.bfloat16), w2.astype(jnp.bfloat16),
                preferred_element_type=jnp.float32)
    h = _leaky_relu(h + b2)
    return jnp.dot(h, w3, precision=hp) + b3


if __name__ == "__main__":
    key = jax.random.PRNGKey(0)
    kp, ks, ka = jax.random.split(key, 3)

    params = init_params(kp)

    # Small-shape check (single grid step).
    B = 8
    s = jax.random.normal(ks, (B, N_STATES), dtype=jnp.float32)
    a = jax.random.normal(ka, (B, N_ACTIONS), dtype=jnp.float32)

    out = jax.block_until_ready(critic_forward(s, a, params))
    assert out.shape == (B, N_ACTIONS), out.shape

    ref_matched = critic_reference_matched(s, a, params)
    assert jnp.allclose(out, ref_matched, atol=1e-3, rtol=1e-3), (out, ref_matched)

    # Looser check against the exact f32 PyTorch-semantics reference
    # (difference comes only from the intentional bf16 cast of fc2).
    ref_f32 = critic_reference(s, a, params)
    assert jnp.allclose(out, ref_f32, atol=5e-2, rtol=5e-2), (out, ref_f32)

    # Multi-step grid check (exercises tiling + batch padding).
    B2 = 300
    ks2, ka2 = jax.random.split(jax.random.PRNGKey(1), 2)
    s2 = jax.random.normal(ks2, (B2, N_STATES), dtype=jnp.float32)
    a2 = jax.random.normal(ka2, (B2, N_ACTIONS), dtype=jnp.float32)
    out2 = jax.block_until_ready(critic_forward(s2, a2, params, block_b=128))
    assert out2.shape == (B2, N_ACTIONS), out2.shape
    ref2 = critic_reference_matched(s2, a2, params)
    assert jnp.allclose(out2, ref2, atol=1e-3, rtol=1e-3), (out2, ref2)

    print("KERNEL_OK")
</pallas_src>

<mosaic_0001>
module attributes {stable_mosaic.version = 11 : i64} {
  func.func @critic_kernel(%arg0: i32, %arg1: memref<3x128xf32, #tpu.memory_space<vmem>>, %arg2: memref<400x3xf32, #tpu.memory_space<vmem>>, %arg3: memref<400x1xf32, #tpu.memory_space<vmem>>, %arg4: memref<300x400xbf16, #tpu.memory_space<vmem>>, %arg5: memref<300x1xf32, #tpu.memory_space<vmem>>, %arg6: memref<300x1xf32, #tpu.memory_space<vmem>>, %arg7: memref<1x1xf32, #tpu.memory_space<smem>>, %arg8: memref<1x128xf32, #tpu.memory_space<vmem>>) attributes {dimension_semantics = [#tpu.dimension_semantics<parallel>], iteration_bounds = array<i64: 1>, scalar_prefetch = 0 : i64, scratch_operands = 0 : i64, tpu.core_type = #tpu.core_type<tc>, window_params = [{transform_indices = @transform_0, window_bounds = array<i64: 3, 128>}, {pipeline_mode = #tpu.pipeline_mode<synchronous>, transform_indices = @transform_1, window_bounds = array<i64: 400, 3>}, {pipeline_mode = #tpu.pipeline_mode<synchronous>, transform_indices = @transform_2, window_bounds = array<i64: 400, 1>}, {pipeline_mode = #tpu.pipeline_mode<synchronous>, transform_indices = @transform_3, window_bounds = array<i64: 300, 400>}, {pipeline_mode = #tpu.pipeline_mode<synchronous>, transform_indices = @transform_4, window_bounds = array<i64: 300, 1>}, {pipeline_mode = #tpu.pipeline_mode<synchronous>, transform_indices = @transform_5, window_bounds = array<i64: 300, 1>}, {transform_indices = @transform_6, window_bounds = array<i64: 1, 1>}, {transform_indices = @transform_7, window_bounds = array<i64: 1, 128>}]} {
    %c0 = arith.constant 0 : index
    %c0_0 = arith.constant 0 : index
    %0 = vector.load %arg1[%c0, %c0_0] : memref<3x128xf32, #tpu.memory_space<vmem>>, vector<3x128xf32>
    %c0_1 = arith.constant 0 : index
    %c0_2 = arith.constant 0 : index
    %1 = vector.load %arg2[%c0_1, %c0_2] : memref<400x3xf32, #tpu.memory_space<vmem>>, vector<400x3xf32>
    %2 = vector.extract_strided_slice %1 {offsets = [0, 0], sizes = [400, 1], strides = [1, 1]} : vector<400x3xf32> to vector<400x1xf32>
    %3 = vector.extract_strided_slice %0 {offsets = [0, 0], sizes = [1, 128], strides = [1, 1]} : vector<3x128xf32> to vector<1x128xf32>
    %4 = vector.broadcast %2 : vector<400x1xf32> to vector<400x128xf32>
    %5 = vector.broadcast %3 : vector<1x128xf32> to vector<400x128xf32>
    %6 = arith.mulf %4, %5 : vector<400x128xf32>
    %7 = vector.extract_strided_slice %1 {offsets = [0, 1], sizes = [400, 1], strides = [1, 1]} : vector<400x3xf32> to vector<400x1xf32>
    %8 = vector.extract_strided_slice %0 {offsets = [1, 0], sizes = [1, 128], strides = [1, 1]} : vector<3x128xf32> to vector<1x128xf32>
    %9 = vector.broadcast %7 : vector<400x1xf32> to vector<400x128xf32>
    %10 = vector.broadcast %8 : vector<1x128xf32> to vector<400x128xf32>
    %11 = arith.mulf %9, %10 : vector<400x128xf32>
    %12 = arith.addf %6, %11 : vector<400x128xf32>
    %13 = vector.extract_strided_slice %1 {offsets = [0, 2], sizes = [400, 1], strides = [1, 1]} : vector<400x3xf32> to vector<400x1xf32>
    %14 = vector.extract_strided_slice %0 {offsets = [2, 0], sizes = [1, 128], strides = [1, 1]} : vector<3x128xf32> to vector<1x128xf32>
    %15 = vector.broadcast %13 : vector<400x1xf32> to vector<400x128xf32>
    %16 = vector.broadcast %14 : vector<1x128xf32> to vector<400x128xf32>
    %17 = arith.mulf %15, %16 : vector<400x128xf32>
    %18 = arith.addf %12, %17 : vector<400x128xf32>
    %c0_3 = arith.constant 0 : index
    %c0_4 = arith.constant 0 : index
    %19 = vector.load %arg3[%c0_3, %c0_4] : memref<400x1xf32, #tpu.memory_space<vmem>>, vector<400x1xf32>
    %20 = vector.broadcast %19 : vector<400x1xf32> to vector<400x128xf32>
    %21 = arith.addf %18, %20 : vector<400x128xf32>
    %cst = arith.constant 0.00999999977 : f32
    %22 = vector.broadcast %cst : f32 to vector<400x128xf32>
    %23 = arith.mulf %22, %21 : vector<400x128xf32>
    %24 = arith.maximumf %21, %23 : vector<400x128xf32>
    %c0_5 = arith.constant 0 : index
    %c0_6 = arith.constant 0 : index
    %25 = vector.load %arg4[%c0_5, %c0_6] : memref<300x400xbf16, #tpu.memory_space<vmem>>, vector<300x400xbf16>
    %26 = arith.truncf %24 : vector<400x128xf32> to vector<400x128xbf16>
    %cst_7 = arith.constant dense<0.000000e+00> : vector<300x128xf32>
    %27 = tpu.matmul %25, %26, %cst_7 {dimension_numbers = #tpu.dot_dimension_numbers<[1], [0], [0], [1], [0, 0, 1, 1], [], []>} : vector<300x400xbf16>, vector<400x128xbf16>, vector<300x128xf32> -> vector<300x128xf32>
    %c0_8 = arith.constant 0 : index
    %c0_9 = arith.constant 0 : index
    %28 = vector.load %arg5[%c0_8, %c0_9] : memref<300x1xf32, #tpu.memory_space<vmem>>, vector<300x1xf32>
    %29 = vector.broadcast %28 : vector<300x1xf32> to vector<300x128xf32>
    %30 = arith.addf %27, %29 : vector<300x128xf32>
    %cst_10 = arith.constant 0.00999999977 : f32
    %31 = vector.broadcast %cst_10 : f32 to vector<300x128xf32>
    %32 = arith.mulf %31, %30 : vector<300x128xf32>
    %33 = arith.maximumf %30, %32 : vector<300x128xf32>
    %c0_11 = arith.constant 0 : index
    %c0_12 = arith.constant 0 : index
    %34 = vector.load %arg6[%c0_11, %c0_12] : memref<300x1xf32, #tpu.memory_space<vmem>>, vector<300x1xf32>
    %35 = vector.broadcast %34 : vector<300x1xf32> to vector<300x128xf32>
    %36 = arith.mulf %33, %35 : vector<300x128xf32>
    %cst_13 = arith.constant dense<0.000000e+00> : vector<128xf32>
    %37 = vector.multi_reduction <add>, %36, %cst_13 [0] : vector<300x128xf32> to vector<128xf32>
    %38 = vector.shape_cast %37 : vector<128xf32> to vector<1x128xf32>
    %c0_14 = arith.constant 0 : index
    %c0_15 = arith.constant 0 : index
    %39 = memref.load %arg7[%c0_14, %c0_15] : memref<1x1xf32, #tpu.memory_space<smem>>
    %40 = vector.broadcast %39 : f32 to vector<1x128xf32>
    %41 = arith.addf %38, %40 : vector<1x128xf32>
    %c0_16 = arith.constant 0 : index
    %c0_17 = arith.constant 0 : index
    %42 = vector.load %arg8[%c0_16, %c0_17] : memref<1x128xf32, #tpu.memory_space<vmem>>, vector<1x128xf32>
    tpu.vector_store %arg8[%c0_16, %c0_17], %41 {strides = array<i32>} : memref<1x128xf32, #tpu.memory_space<vmem>>, vector<1x128xf32>,
    return
  }
  func.func @transform_0(%arg0: i32) -> (i32, i32) {
    %c0_i32 = arith.constant 0 : i32
    %c0_i32_0 = arith.constant 0 : i32
    return %c0_i32, %arg0 : i32, i32
  }
  func.func @transform_1(%arg0: i32) -> (i32, i32) {
    %c0_i32 = arith.constant 0 : i32
    %c0_i32_0 = arith.constant 0 : i32
    %c0_i32_1 = arith.constant 0 : i32
    return %c0_i32, %c0_i32_0 : i32, i32
  }
  func.func @transform_2(%arg0: i32) -> (i32, i32) {
    %c0_i32 = arith.constant 0 : i32
    %c0_i32_0 = arith.constant 0 : i32
    %c0_i32_1 = arith.constant 0 : i32
    return %c0_i32, %c0_i32_0 : i32, i32
  }
  func.func @transform_3(%arg0: i32) -> (i32, i32) {
    %c0_i32 = arith.constant 0 : i32
    %c0_i32_0 = arith.constant 0 : i32
    %c0_i32_1 = arith.constant 0 : i32
    return %c0_i32, %c0_i32_0 : i32, i32
  }
  func.func @transform_4(%arg0: i32) -> (i32, i32) {
    %c0_i32 = arith.constant 0 : i32
    %c0_i32_0 = arith.constant 0 : i32
    %c0_i32_1 = arith.constant 0 : i32
    return %c0_i32, %c0_i32_0 : i32, i32
  }
  func.func @transform_5(%arg0: i32) -> (i32, i32) {
    %c0_i32 = arith.constant 0 : i32
    %c0_i32_0 = arith.constant 0 : i32
    %c0_i32_1 = arith.constant 0 : i32
    return %c0_i32, %c0_i32_0 : i32, i32
  }
  func.func @transform_6(%arg0: i32) -> (i32, i32) {
    %c0_i32 = arith.constant 0 : i32
    %c0_i32_0 = arith.constant 0 : i32
    %c0_i32_1 = arith.constant 0 : i32
    return %c0_i32, %c0_i32_0 : i32, i32
  }
  func.func @transform_7(%arg0: i32) -> (i32, i32) {
    %c0_i32 = arith.constant 0 : i32
    %c0_i32_0 = arith.constant 0 : i32
    return %c0_i32, %arg0 : i32, i32
  }
}

</mosaic_0001>

<bundles_post_ra>
// kernel: tpu_custom_call.1
= control target key start
LH: loop header
LB: loop body
LE: loop exit
PB: predicated region body
PF: predicated region fallthrough
CT: control target
= control target key end

     0   :  { %v3289_v2 = vmov 1   ;;  %v5187_v3 = vmov 0   ;;  %s5177_s0 = inlined_call_operand.vmem [shape: f32[3,128], index: 0, kind: input, shape index: {}]   ;;  %s5178_s1 = inlined_call_operand.vmem [shape: f32[400,3], index: 1, kind: input, shape index: {}]   ;;  %s5179_s2 = inlined_call_operand.vmem [shape: f32[400,1], index: 2, kind: input, shape index: {}]   ;;  %s5180_s3 = inlined_call_operand.vmem [shape: bf16[300,400], index: 3, kind: input, shape index: {}]   ;;  %s5181_s4 = inlined_call_operand.vmem [shape: f32[300,1], index: 4, kind: input, shape index: {}]   ;;  %s5182_s5 = inlined_call_operand.vmem [shape: f32[300,1], index: 5, kind: input, shape index: {}]   ;;  %s5183_s6 = inlined_call_operand.<no memory space> [shape: f32[1,1], index: 6, kind: input, shape index: {}]   ;;  %s5184_s7 = inlined_call_operand.hbm [shape: f32[1,128], index: 7, kind: output, shape index: {}]  }
   0x1   :  { %v3336_v0 = vld [vmem:[%s5178_s1 + $0x10] sm:$0xff]  ;;  %v3341_v1 = vld [vmem:[%s5178_s1] sm:$0xff]  ;;  %3141 = vset.pattern.permute.xlu0 %v3289_v2  ;;  %3140 = vset.pattern.permute.xlu1 %v5187_v3  ;;  %v3350_v4 = vld [vmem:[%s5178_s1 + $0x18] sm:$0xff] }
   0x2   :  { %92 = vperm.xlu1 %3140, %v3336_v0   ;;  %385 = vperm.xlu0 %3141, %v3341_v1   ;;  %v3359_v5 = vld [vmem:[%s5178_s1 + $0x28] sm:$0xff]  ;;  %v3366_v6 = vld [vmem:[%s5178_s1 + $0x38] sm:$0xff] }
   0x3   :  { %2190 = vmatprep.subr.bf16.mxu1 %v5187_v3  ;;  %2375 = vmatprep.subr.bf16.mxu0 %v5187_v3  ;;  %v3373_v7 = vld [vmem:[%s5178_s1 + $0x48] sm:$0xff]  ;;  %v3380_v8 = vld [vmem:[%s5178_s1 + $0x58] sm:$0xff] }
   0x4   :  { %v3387_v9 = vld [vmem:[%s5178_s1 + $0x68] sm:$0xff]  ;;  %v3394_v10 = vld [vmem:[%s5178_s1 + $0x78] sm:$0xff] }
   0x5   :  { %v3401_v11 = vld [vmem:[%s5178_s1 + $0x88] sm:$0xff]  ;;  %v3408_v12 = vld [vmem:[%s5178_s1 + $0x98] sm:$0xff] }
   0x6   :  { %97 = vperm.xlu1 %3140, %v3350_v4   ;;  %397 = vperm.xlu0 %3141, %v3350_v4   ;;  %v3415_v13 = vld [vmem:[%s5178_s1 + $0xa8] sm:$0xff] }
   0xa   :  { %107 = vperm.xlu1 %3140, %v3359_v5   ;;  %405 = vperm.xlu0 %3141, %v3359_v5  }
   0xe   :  { %117 = vperm.xlu1 %3140, %v3366_v6   ;;  %413 = vperm.xlu0 %3141, %v3366_v6  }
  0x12   :  { %127 = vperm.xlu1 %3140, %v3373_v7   ;;  %421 = vperm.xlu0 %3141, %v3373_v7  }
  0x16   :  { %137 = vperm.xlu1 %3140, %v3380_v8   ;;  %429 = vperm.xlu0 %3141, %v3380_v8  }
  0x1a   :  { %147 = vperm.xlu1 %3140, %v3387_v9   ;;  %437 = vperm.xlu0 %3141, %v3387_v9  }
  0x1e   :  { %157 = vperm.xlu1 %3140, %v3394_v10   ;;  %445 = vperm.xlu0 %3141, %v3394_v10  }
  0x22   :  { %167 = vperm.xlu1 %3140, %v3401_v11   ;;  %453 = vperm.xlu0 %3141, %v3401_v11  }
  0x26   :  { %177 = vperm.xlu1 %3140, %v3408_v12   ;;  %461 = vperm.xlu0 %3141, %v3408_v12  }
  0x27   :  { %13 = vsyncpa [#allocation4], 0  ;;  %v3422_v14 = vld [vmem:[%s5178_s1 + $0xb8] sm:$0xff]  ;;  %v3429_v15 = vld [vmem:[%s5178_s1 + $0xc8] sm:$0xff]  ;;  %v5185_v29 = vmov 2   ;;  %vm2132_vm0 = vcmask 130048  }
  0x28   :  { %v3436_v16 = vld [vmem:[%s5178_s1 + $0xd8] sm:$0xff]  ;;  %v3443_v17 = vld [vmem:[%s5178_s1 + $0xe8] sm:$0xff]  ;;  %v3529_v30 = vld [vmem:[%s5178_s1 + $0x20] sm:$0xff]  ;;  %vm2938_vm1 = vcmask 1043456   ;;  %s3292_s23 = smov [#allocation3]  }
  0x29   :  { %v3450_v18 = vld [vmem:[%s5178_s1 + $0xf8] sm:$0xff]  ;;  %v3457_v19 = vld [vmem:[%s5178_s1 + $0x108] sm:$0xff]  ;;  %v3536_v31 = vld [vmem:[%s5178_s1 + $0x30] sm:$0xff] }
  0x2a   :  { %187 = vperm.xlu1 %3140, %v3415_v13   ;;  %469 = vperm.xlu0 %3141, %v3415_v13   ;;  %v3464_v20 = vld [vmem:[%s5178_s1 + $0x118] sm:$0xff]  ;;  %v3471_v21 = vld [vmem:[%s5178_s1 + $0x128] sm:$0xff]  ;;  %v3543_v32 = vld [vmem:[%s5178_s1 + $0x40] sm:$0xff] }
  0x2b   :  { %v3478_v22 = vld [vmem:[%s5178_s1 + $0x138] sm:$0xff]  ;;  %v3485_v23 = vld [vmem:[%s5178_s1 + $0x148] sm:$0xff]  ;;  %v3550_v33 = vld [vmem:[%s5178_s1 + $0x50] sm:$0xff] }
  0x2c   :  { %v3492_v24 = vld [vmem:[%s5178_s1 + $0x158] sm:$0xff]  ;;  %v3499_v25 = vld [vmem:[%s5178_s1 + $0x168] sm:$0xff]  ;;  %v3557_v34 = vld [vmem:[%s5178_s1 + $0x60] sm:$0xff] }
  0x2d   :  { %v3506_v26 = vld [vmem:[%s5178_s1 + $0x178] sm:$0xff]  ;;  %v3513_v27 = vld [vmem:[%s5178_s1 + $0x188] sm:$0xff]  ;;  %v3564_v35 = vld [vmem:[%s5178_s1 + $0x70] sm:$0xff] }
  0x2e   :  { %197 = vperm.xlu1 %3140, %v3422_v14   ;;  %477 = vperm.xlu0 %3141, %v3422_v14   ;;  %v3520_v28 = vld [vmem:[%s5178_s1 + $0x8] sm:$0xff]  ;;  %v3571_v36 = vld [vmem:[%s5178_s1 + $0x80] sm:$0xff]  ;;  %v3582_v39 = vld [vmem:[%s5178_s1 + $0x90] sm:$0xff] }
  0x2f   :  { %v3593_v42 = vld [vmem:[%s5178_s1 + $0xa0] sm:$0xff]  ;;  %v3604_v45 = vld [vmem:[%s5178_s1 + $0xb0] sm:$0xff] }
  0x30   :  { %v3615_v48 = vld [vmem:[%s5178_s1 + $0xc0] sm:$0xff]  ;;  %v3626_v51 = vld [vmem:[%s5178_s1 + $0xd0] sm:$0xff] }
  0x31   :  { %v3637_v54 = vld [vmem:[%s5178_s1 + $0xe0] sm:$0xff]  ;;  %v3648_v57 = vld [vmem:[%s5178_s1 + $0xf0] sm:$0xff] }
  0x32   :  { %207 = vperm.xlu1 %3140, %v3429_v15   ;;  %485 = vperm.xlu0 %3141, %v3429_v15   ;;  %v3659_v60 = vld [vmem:[%s5178_s1 + $0x100] sm:$0xff]  ;;  %v3670_v63 = vld [vmem:[%s5178_s1 + $0x110] sm:$0xff] }
  0x33   :  { %v3681_v3 = vld [vmem:[%s5178_s1 + $0x120] sm:$0xff] }
  0x36   :  { %217 = vperm.xlu1 %3140, %v3436_v16   ;;  %493 = vperm.xlu0 %3141, %v3436_v16  }
  0x3a   :  { %227 = vperm.xlu1 %3140, %v3443_v17   ;;  %501 = vperm.xlu0 %3141, %v3443_v17  }
  0x3e   :  { %237 = vperm.xlu1 %3140, %v3450_v18   ;;  %509 = vperm.xlu0 %3141, %v3450_v18  }
  0x42   :  { %247 = vperm.xlu1 %3140, %v3457_v19   ;;  %517 = vperm.xlu0 %3141, %v3457_v19  }
  0x46   :  { %257 = vperm.xlu1 %3140, %v3464_v20   ;;  %525 = vperm.xlu0 %3141, %v3464_v20  }
  0x4a   :  { %267 = vperm.xlu1 %3140, %v3471_v21   ;;  %533 = vperm.xlu0 %3141, %v3471_v21  }
  0x4e   :  { %277 = vperm.xlu1 %3140, %v3478_v22   ;;  %541 = vperm.xlu0 %3141, %v3478_v22  }
  0x52   :  { %287 = vperm.xlu1 %3140, %v3485_v23   ;;  %549 = vperm.xlu0 %3141, %v3485_v23  }
  0x56   :  { %297 = vperm.xlu1 %3140, %v3492_v24   ;;  %557 = vperm.xlu0 %3141, %v3492_v24  }
  0x5a   :  { %307 = vperm.xlu1 %3140, %v3499_v25   ;;  %565 = vperm.xlu0 %3141, %v3499_v25  }
  0x5e   :  { %317 = vperm.xlu1 %3140, %v3506_v26   ;;  %573 = vperm.xlu0 %3141, %v3506_v26  }
  0x62   :  { %327 = vperm.xlu1 %3140, %v3513_v27   ;;  %581 = vperm.xlu0 %3141, %v3513_v27  }
  0x66   :  { %3142 = vset.pattern.permute.xlu1 %v3289_v2  ;;  %3144 = vset.pattern.permute.xlu0 %v5185_v29 }
  0x67   :  { %389 = vperm.xlu1 %3142, %v3520_v28   ;;  %693 = vperm.xlu0 %3144, %v3520_v28  }
  0x6b   :  { %393 = vperm.xlu1 %3142, %v3336_v0   ;;  %705 = vperm.xlu0 %3144, %v3529_v30  }
  0x6f   :  { %401 = vperm.xlu1 %3142, %v3529_v30   ;;  %713 = vperm.xlu0 %3144, %v3536_v31  }
  0x73   :  { %409 = vperm.xlu1 %3142, %v3536_v31   ;;  %721 = vperm.xlu0 %3144, %v3543_v32  }
  0x77   :  { %417 = vperm.xlu1 %3142, %v3543_v32   ;;  %729 = vperm.xlu0 %3144, %v3550_v33  }
  0x7b   :  { %425 = vperm.xlu1 %3142, %v3550_v33   ;;  %737 = vperm.xlu0 %3144, %v3557_v34  }
  0x7f   :  { %433 = vperm.xlu1 %3142, %v3557_v34   ;;  %745 = vperm.xlu0 %3144, %v3564_v35  }
  0x81   :  { %v3573_v37 = vpop.permute.xlu1 %92  ;;  %v3575_v38 = vpop.permute.xlu0 %385 }
  0x82   :  { %5189 = vst [vmem:[#allocation6_spill] sm:$0xff] %v3573_v37  ;;  %5190 = vst [vmem:[#allocation7_spill] sm:$0xff] %v3575_v38  ;;  %v3742_v38 = vld [vmem:[%s5178_s1 + $0x170] sm:$0xff]  ;;  %v5217_v37 = vmov 0  }
  0x83   :  { %441 = vperm.xlu1 %3142, %v3564_v35   ;;  %753 = vperm.xlu0 %3144, %v3571_v36  }
  0x85   :  { %v3584_v40 = vpop.permute.xlu1 %97  ;;  %v3586_v41 = vpop.permute.xlu0 %397 }
  0x87   :  { %449 = vperm.xlu1 %3142, %v3571_v36   ;;  %761 = vperm.xlu0 %3144, %v3582_v39  }
  0x89   :  { %v3595_v43 = vpop.permute.xlu1 %107  ;;  %v3597_v44 = vpop.permute.xlu0 %405 }
  0x8b   :  { %457 = vperm.xlu1 %3142, %v3582_v39   ;;  %769 = vperm.xlu0 %3144, %v3593_v42  }
  0x8d   :  { %v3606_v46 = vpop.permute.xlu1 %117  ;;  %v3608_v47 = vpop.permute.xlu0 %413 }
  0x8f   :  { %465 = vperm.xlu1 %3142, %v3593_v42   ;;  %777 = vperm.xlu0 %3144, %v3604_v45  }
  0x91   :  { %v3617_v49 = vpop.permute.xlu1 %127  ;;  %v3619_v50 = vpop.permute.xlu0 %421 }
  0x93   :  { %473 = vperm.xlu1 %3142, %v3604_v45   ;;  %785 = vperm.xlu0 %3144, %v3615_v48  }
  0x95   :  { %v3628_v52 = vpop.permute.xlu1 %137  ;;  %v3630_v53 = vpop.permute.xlu0 %429 }
  0x96   :  { %5191 = vst [vmem:[#allocation8_spill] sm:$0xff] %v3628_v52  ;;  %5192 = vst [vmem:[#allocation9_spill] sm:$0xff] %v3630_v53 }
  0x97   :  { %481 = vperm.xlu1 %3142, %v3615_v48   ;;  %793 = vperm.xlu0 %3144, %v3626_v51  }
  0x99   :  { %v3639_v55 = vpop.permute.xlu1 %147  ;;  %v3641_v56 = vpop.permute.xlu0 %437 }
  0x9a   :  { %5193 = vst [vmem:[#allocation10_spill] sm:$0xff] %v3639_v55  ;;  %5194 = vst [vmem:[#allocation11_spill] sm:$0xff] %v3641_v56 }
  0x9b   :  { %489 = vperm.xlu1 %3142, %v3626_v51   ;;  %801 = vperm.xlu0 %3144, %v3637_v54  }
  0x9d   :  { %v3650_v58 = vpop.permute.xlu1 %157  ;;  %v3652_v59 = vpop.permute.xlu0 %445 }
  0x9e   :  { %5195 = vst [vmem:[#allocation12_spill] sm:$0xff] %v3650_v58  ;;  %5196 = vst [vmem:[#allocation13_spill] sm:$0xff] %v3652_v59 }
  0x9f   :  { %497 = vperm.xlu1 %3142, %v3637_v54   ;;  %809 = vperm.xlu0 %3144, %v3648_v57  }
  0xa1   :  { %v3661_v61 = vpop.permute.xlu1 %167  ;;  %v3663_v62 = vpop.permute.xlu0 %453 }
  0xa2   :  { %5197 = vst [vmem:[#allocation14_spill] sm:$0xff] %v3661_v61  ;;  %5198 = vst [vmem:[#allocation15_spill] sm:$0xff] %v3663_v62 }
  0xa3   :  { %505 = vperm.xlu1 %3142, %v3648_v57   ;;  %817 = vperm.xlu0 %3144, %v3659_v60  }
  0xa5   :  { %v3672_v2 = vpop.permute.xlu1 %177  ;;  %v3674_v29 = vpop.permute.xlu0 %461 }
  0xa6   :  { %5199 = vst [vmem:[#allocation16_spill] sm:$0xff] %v3672_v2  ;;  %5200 = vst [vmem:[#allocation17_spill] sm:$0xff] %v3674_v29  ;;  %v3692_v29 = vld [vmem:[%s5178_s1 + $0x130] sm:$0xff] }
  0xa7   :  { %513 = vperm.xlu1 %3142, %v3659_v60   ;;  %825 = vperm.xlu0 %3144, %v3670_v63  }
  0xa9   :  { %v3683_v62 = vpop.permute.xlu1 %187  ;;  %v3685_v61 = vpop.permute.xlu0 %469 }
  0xaa   :  { %5201 = vst [vmem:[#allocation18_spill] sm:$0xff] %v3683_v62  ;;  %5202 = vst [vmem:[#allocation19_spill] sm:$0xff] %v3685_v61  ;;  %v3703_v61 = vld [vmem:[%s5178_s1 + $0x140] sm:$0xff] }
  0xab   :  { %521 = vperm.xlu1 %3142, %v3670_v63   ;;  %833 = vperm.xlu0 %3144, %v3681_v3  }
  0xad   :  { %v3694_v2 = vpop.permute.xlu1 %197  ;;  %v3696_v59 = vpop.permute.xlu0 %477 }
  0xae   :  { %5203 = vst [vmem:[#allocation20_spill] sm:$0xff] %v3694_v2  ;;  %5204 = vst [vmem:[#allocation21_spill] sm:$0xff] %v3696_v59  ;;  %v3714_v59 = vld [vmem:[%s5178_s1 + $0x150] sm:$0xff] }
  0xaf   :  { %529 = vperm.xlu1 %3142, %v3681_v3   ;;  %841 = vperm.xlu0 %3144, %v3692_v29  }
  0xb1   :  { %v3705_v62 = vpop.permute.xlu1 %207  ;;  %v3707_v58 = vpop.permute.xlu0 %485 }
  0xb2   :  { %5205 = vst [vmem:[#allocation22_spill] sm:$0xff] %v3705_v62  ;;  %5206 = vst [vmem:[#allocation23_spill] sm:$0xff] %v3707_v58  ;;  %v3725_v58 = vld [vmem:[%s5178_s1 + $0x160] sm:$0xff] }
  0xb3   :  { %537 = vperm.xlu1 %3142, %v3692_v29   ;;  %849 = vperm.xlu0 %3144, %v3703_v61  }
  0xb5   :  { %v3716_v2 = vpop.permute.xlu1 %217  ;;  %v3718_v56 = vpop.permute.xlu0 %493 }
  0xb6   :  { %5207 = vst [vmem:[#allocation24_spill] sm:$0xff] %v3716_v2  ;;  %5208 = vst [vmem:[#allocation25_spill] sm:$0xff] %v3718_v56 }
  0xb7   :  { %545 = vperm.xlu1 %3142, %v3703_v61   ;;  %857 = vperm.xlu0 %3144, %v3714_v59  }
  0xb9   :  { %v3727_v62 = vpop.permute.xlu1 %227  ;;  %v3729_v55 = vpop.permute.xlu0 %501 }
  0xba   :  { %5209 = vst [vmem:[#allocation26_spill] sm:$0xff] %v3727_v62  ;;  %5210 = vst [vmem:[#allocation27_spill] sm:$0xff] %v3729_v55 }
  0xbb   :  { %553 = vperm.xlu1 %3142, %v3714_v59   ;;  %865 = vperm.xlu0 %3144, %v3725_v58  }
  0xbd   :  { %v3733_v2 = vpop.permute.xlu1 %237  ;;  %v3735_v56 = vpop.permute.xlu0 %509 }
  0xbe   :  { %5211 = vst [vmem:[#allocation28_spill] sm:$0xff] %v3733_v2  ;;  %5212 = vst [vmem:[#allocation29_spill] sm:$0xff] %v3735_v56  ;;  %v3753_v56 = vld [vmem:[%s5178_s1 + $0x180] sm:$0xff] }
  0xbf   :  { %561 = vperm.xlu1 %3142, %v3725_v58   ;;  %877 = vperm.xlu0 %3144, %v3506_v26  }
  0xc1   :  { %v3744_v62 = vpop.permute.xlu1 %247  ;;  %v3746_v55 = vpop.permute.xlu0 %517 }
  0xc2   :  { %5213 = vst [vmem:[#allocation30_spill] sm:$0xff] %v3744_v62  ;;  %5214 = vst [vmem:[#allocation31_spill] sm:$0xff] %v3746_v55 }
  0xc3   :  { %569 = vperm.xlu1 %3142, %v3742_v38   ;;  %885 = vperm.xlu0 %3144, %v3513_v27   ;;  %v5220_v27 = vmov 2  }
  0xc5   :  { %v3755_v2 = vpop.permute.xlu1 %257  ;;  %v3757_v26 = vpop.permute.xlu0 %525 }
  0xc6   :  { %5215 = vst [vmem:[#allocation32_spill] sm:$0xff] %v3755_v2  ;;  %5216 = vst [vmem:[#allocation33_spill] sm:$0xff] %v3757_v26 }
  0xc7   :  { %577 = vperm.xlu1 %3142, %v3753_v56   ;;  %3149 = vset.pattern.permute.xlu0 %v5217_v37 }
  0xc8   :  { %82 = vperm.xlu0 %3149, %v3341_v1  }
  0xc9   :  { %v3762_v55 = vpop.permute.xlu1 %267  ;;  %v3764_v62 = vpop.permute.xlu0 %533 }
  0xca   :  { %5218 = vst [vmem:[#allocation34_spill] sm:$0xff] %v3762_v55  ;;  %5219 = vst [vmem:[#allocation35_spill] sm:$0xff] %v3764_v62 }
  0xcb   :  { %3143 = vset.pattern.permute.xlu1 %v5220_v27 }
  0xcc   :  { %689 = vperm.xlu1 %3143, %v3341_v1   ;;  %87 = vperm.xlu0 %3149, %v3520_v28  }
  0xcd   :  { %v3769_v53 = vpop.permute.xlu1 %277  ;;  %v3771_v2 = vpop.permute.xlu0 %541 }
  0xce   :  { %5221 = vst [vmem:[#allocation36_spill] sm:$0xff] %v3769_v53  ;;  %5222 = vst [vmem:[#allocation37_spill] sm:$0xff] %v3771_v2 }
  0xd0   :  { %697 = vperm.xlu1 %3143, %v3336_v0   ;;  %102 = vperm.xlu0 %3149, %v3529_v30  }
  0xd1   :  { %v3775_v26 = vpop.permute.xlu1 %287  ;;  %v3777_v52 = vpop.permute.xlu0 %549 }
  0xd2   :  { %5223 = vst [vmem:[#allocation38_spill] sm:$0xff] %v3775_v26  ;;  %5224 = vst [vmem:[#allocation39_spill] sm:$0xff] %v3777_v52  ;;  %v1015_v52 = vld [vmem:[%s5179_s2 + $0xb8] sm:$0xff] }
  0xd4   :  { %701 = vperm.xlu1 %3143, %v3350_v4   ;;  %112 = vperm.xlu0 %3149, %v3536_v31  }
  0xd5   :  { %v3781_v62 = vpop.permute.xlu1 %297  ;;  %v3783_v1 = vpop.permute.xlu0 %557 }
  0xd6   :  { %5225 = vst [vmem:[#allocation40_spill] sm:$0xff] %v3781_v62  ;;  %5226 = vst [vmem:[#allocation41_spill] sm:$0xff] %v3783_v1  ;;  %v1011_v1 = vld [vmem:[%s5179_s2 + $0x98] sm:$0xff] }
  0xd8   :  { %709 = vperm.xlu1 %3143, %v3359_v5   ;;  %122 = vperm.xlu0 %3149, %v3543_v32  }
  0xd9   :  { %v3787_v28 = vpop.permute.xlu1 %307  ;;  %v3789_v0 = vpop.permute.xlu0 %565 }
  0xda   :  { %5227 = vst [vmem:[#allocation42_spill] sm:$0xff] %v3787_v28  ;;  %5228 = vst [vmem:[#allocation43_spill] sm:$0xff] %v3789_v0  ;;  %v1000_v0 = vld [vmem:[%s5179_s2 + $0x40] sm:$0xff]  ;;  %v1003_v28 = vld [vmem:[%s5179_s2 + $0x58] sm:$0xff] }
  0xdc   :  { %717 = vperm.xlu1 %3143, %v3366_v6   ;;  %132 = vperm.xlu0 %3149, %v3550_v33  }
  0xdd   :  { %v3793_v30 = vpop.permute.xlu1 %317  ;;  %v3795_v4 = vpop.permute.xlu0 %573 }
  0xde   :  { %5229 = vst [vmem:[#allocation44_spill] sm:$0xff] %v3793_v30  ;;  %5230 = vst [vmem:[#allocation45_spill] sm:$0xff] %v3795_v4  ;;  %v997_v4 = vld [vmem:[%s5179_s2 + $0x28] sm:$0xff]  ;;  %v996_v30 = vld [vmem:[%s5179_s2 + $0x20] sm:$0xff] }
  0xe0   :  { %725 = vperm.xlu1 %3143, %v3373_v7   ;;  %142 = vperm.xlu0 %3149, %v3557_v34  }
  0xe1   :  { %v3799_v31 = vpop.permute.xlu1 %327  ;;  %v3801_v5 = vpop.permute.xlu0 %581 }
  0xe2   :  { %5231 = vst [vmem:[#allocation46_spill] sm:$0xff] %v3799_v31  ;;  %5232 = vst [vmem:[#allocation47_spill] sm:$0xff] %v3801_v5 }
  0xe4   :  { %733 = vperm.xlu1 %3143, %v3380_v8   ;;  %152 = vperm.xlu0 %3149, %v3564_v35  }
  0xe6   :  { %v3805_v32 = vpop.permute.xlu1 %389  ;;  %v3807_v6 = vpop.permute.xlu0 %693 }
  0xe8   :  { %741 = vperm.xlu1 %3143, %v3387_v9   ;;  %162 = vperm.xlu0 %3149, %v3571_v36  }
  0xea   :  { %v3811_v33 = vpop.permute.xlu1 %393  ;;  %v3813_v7 = vpop.permute.xlu0 %705 }
  0xec   :  { %749 = vperm.xlu1 %3143, %v3394_v10   ;;  %172 = vperm.xlu0 %3149, %v3582_v39  }
  0xee   :  { %v3817_v34 = vpop.permute.xlu1 %401  ;;  %v3819_v8 = vpop.permute.xlu0 %713 }
  0xf0   :  { %757 = vperm.xlu1 %3143, %v3401_v11   ;;  %182 = vperm.xlu0 %3149, %v3593_v42  }
  0xf2   :  { %v3823_v35 = vpop.permute.xlu1 %409  ;;  %v3825_v9 = vpop.permute.xlu0 %721 }
  0xf4   :  { %765 = vperm.xlu1 %3143, %v3408_v12   ;;  %192 = vperm.xlu0 %3149, %v3604_v45  }
  0xf6   :  { %v3829_v36 = vpop.permute.xlu1 %417  ;;  %v3831_v10 = vpop.permute.xlu0 %729 }
  0xf8   :  { %773 = vperm.xlu1 %3143, %v3415_v13   ;;  %202 = vperm.xlu0 %3149, %v3615_v48  }
  0xfa   :  { %v3835_v39 = vpop.permute.xlu1 %425  ;;  %v3837_v11 = vpop.permute.xlu0 %737 }
  0xfb   :  { %5233 = vst [vmem:[#allocation48_spill] sm:$0xff] %v3837_v11  ;;  %v5319_v11 = vld [vmem:[#allocation23_spill] sm:$0xff] }
  0xfc   :  { %781 = vperm.xlu1 %3143, %v3422_v14   ;;  %212 = vperm.xlu0 %3149, %v3626_v51  }
  0xfe   :  { %v3841_v42 = vpop.permute.xlu1 %433  ;;  %v3843_v12 = vpop.permute.xlu0 %745 }
  0xff   :  { %5234 = vst [vmem:[#allocation49_spill] sm:$0xff] %v3843_v12 }
 0x100   :  { %789 = vperm.xlu1 %3143, %v3429_v15   ;;  %222 = vperm.xlu0 %3149, %v3637_v54  }
 0x102   :  { %v3847_v45 = vpop.permute.xlu1 %441  ;;  %v3849_v13 = vpop.permute.xlu0 %753 }
 0x103   :  { %5235 = vst [vmem:[#allocation50_spill] sm:$0xff] %v3847_v45  ;;  %5236 = vst [vmem:[#allocation51_spill] sm:$0xff] %v3849_v13 }
 0x104   :  { %797 = vperm.xlu1 %3143, %v3436_v16   ;;  %232 = vperm.xlu0 %3149, %v3648_v57  }
 0x106   :  { %v3853_v48 = vpop.permute.xlu1 %449  ;;  %v3855_v14 = vpop.permute.xlu0 %761 }
 0x107   :  { %5237 = vst [vmem:[#allocation52_spill] sm:$0xff] %v3853_v48  ;;  %5238 = vst [vmem:[#allocation53_spill] sm:$0xff] %v3855_v14 }
 0x108   :  { %805 = vperm.xlu1 %3143, %v3443_v17   ;;  %242 = vperm.xlu0 %3149, %v3659_v60  }
 0x10a   :  { %v3859_v51 = vpop.permute.xlu1 %457  ;;  %v3861_v15 = vpop.permute.xlu0 %769 }
 0x10b   :  { %5239 = vst [vmem:[#allocation54_spill] sm:$0xff] %v3859_v51  ;;  %5240 = vst [vmem:[#allocation55_spill] sm:$0xff] %v3861_v15  ;;  %v1033_v15 = vld [vmem:[%s5179_s2 + $0x148] sm:$0xff] }
 0x10c   :  { %813 = vperm.xlu1 %3143, %v3450_v18   ;;  %252 = vperm.xlu0 %3149, %v3670_v63  }
 0x10e   :  { %v3865_v54 = vpop.permute.xlu1 %465  ;;  %v3867_v16 = vpop.permute.xlu0 %777 }
 0x10f   :  { %5241 = vst [vmem:[#allocation56_spill] sm:$0xff] %v3865_v54  ;;  %5242 = vst [vmem:[#allocation57_spill] sm:$0xff] %v3867_v16 }
 0x110   :  { %821 = vperm.xlu1 %3143, %v3457_v19   ;;  %262 = vperm.xlu0 %3149, %v3681_v3  }
 0x112   :  { %v3871_v57 = vpop.permute.xlu1 %473  ;;  %v3873_v17 = vpop.permute.xlu0 %785 }
 0x113   :  { %5243 = vst [vmem:[#allocation58_spill] sm:$0xff] %v3871_v57  ;;  %5244 = vst [vmem:[#allocation59_spill] sm:$0xff] %v3873_v17 }
 0x114   :  { %829 = vperm.xlu1 %3143, %v3464_v20   ;;  %272 = vperm.xlu0 %3149, %v3692_v29  }
 0x116   :  { %v3877_v60 = vpop.permute.xlu1 %481  ;;  %v3879_v18 = vpop.permute.xlu0 %793 }
 0x117   :  { %5245 = vst [vmem:[#allocation60_spill] sm:$0xff] %v3877_v60  ;;  %5246 = vst [vmem:[#allocation61_spill] sm:$0xff] %v3879_v18  ;;  %v1002_v18 = vld [vmem:[%s5179_s2 + $0x50] sm:$0xff]  ;;  %v1029_v60 = vld [vmem:[%s5179_s2 + $0x128] sm:$0xff] }
 0x118   :  { %837 = vperm.xlu1 %3143, %v3471_v21   ;;  %282 = vperm.xlu0 %3149, %v3703_v61  }
 0x11a   :  { %v3883_v63 = vpop.permute.xlu1 %489  ;;  %v3885_v19 = vpop.permute.xlu0 %801 }
 0x11b   :  { %5247 = vst [vmem:[#allocation62_spill] sm:$0xff] %v3883_v63  ;;  %5248 = vst [vmem:[#allocation63_spill] sm:$0xff] %v3885_v19  ;;  %v998_v19 = vld [vmem:[%s5179_s2 + $0x30] sm:$0xff] }
 0x11c   :  { %845 = vperm.xlu1 %3143, %v3478_v22   ;;  %292 = vperm.xlu0 %3149, %v3714_v59  }
 0x11e   :  { %v3889_v3 = vpop.permute.xlu1 %497  ;;  %v3891_v20 = vpop.permute.xlu0 %809 }
 0x11f   :  { %5249 = vst [vmem:[#allocation64_spill] sm:$0xff] %v3889_v3  ;;  %5250 = vst [vmem:[#allocation65_spill] sm:$0xff] %v3891_v20  ;;  %v994_v20 = vld [vmem:[%s5179_s2 + $0x10] sm:$0xff]  ;;  %v1001_v3 = vld [vmem:[%s5179_s2 + $0x48] sm:$0xff] }
 0x120   :  { %853 = vperm.xlu1 %3143, %v3485_v23   ;;  %302 = vperm.xlu0 %3149, %v3725_v58   ;;  %v992_v23 = vld [vmem:[%s5179_s2] sm:$0xff] }
 0x122   :  { %v3895_v29 = vpop.permute.xlu1 %505  ;;  %v3897_v21 = vpop.permute.xlu0 %817 }
 0x123   :  { %5251 = vst [vmem:[#allocation66_spill] sm:$0xff] %v3895_v29  ;;  %5252 = vst [vmem:[#allocation67_spill] sm:$0xff] %v3897_v21  ;;  %v999_v29 = vld [vmem:[%s5179_s2 + $0x38] sm:$0xff] }
 0x124   :  { %861 = vperm.xlu1 %3143, %v3492_v24   ;;  %312 = vperm.xlu0 %3149, %v3742_v38   ;;  %v993_v24 = vld [vmem:[%s5179_s2 + $0x8] sm:$0xff] }
 0x126   :  { %v3901_v61 = vpop.permute.xlu1 %513  ;;  %v3903_v22 = vpop.permute.xlu0 %825 }
 0x127   :  { %5253 = vst [vmem:[#allocation68_spill] sm:$0xff] %v3901_v61  ;;  %5254 = vst [vmem:[#allocation69_spill] sm:$0xff] %v3903_v22 }
 0x128   :  { %869 = vperm.xlu1 %3143, %v3499_v25   ;;  %322 = vperm.xlu0 %3149, %v3753_v56   ;;  %v995_v25 = vld [vmem:[%s5179_s2 + $0x18] sm:$0xff] }
 0x12a   :  { %v3910_v58 = vpop.permute.xlu1 %521  ;;  %v3912_v59 = vpop.permute.xlu0 %833 }
 0x12b   :  { %5255 = vst [vmem:[#allocation70_spill] sm:$0xff] %v3910_v58  ;;  %5256 = vst [vmem:[#allocation71_spill] sm:$0xff] %v3912_v59  ;;  %v1017_v59 = vld [vmem:[%s5179_s2 + $0xc8] sm:$0xff] }
 0x12c   :  { %3145 = vset.pattern.permute.xlu1 %v5217_v37  ;;  %1044 = vperm.xlu0 %3149, %v992_v23  }
 0x12d   :  { %1049 = vperm.xlu1 %3145, %v993_v24  }
 0x12e   :  { %v3921_v5 = vpop.permute.xlu1 %529  ;;  %v3923_v31 = vpop.permute.xlu0 %841 }
 0x12f   :  { %5257 = vst [vmem:[#allocation72_spill] sm:$0xff] %v3921_v5  ;;  %5258 = vst [vmem:[#allocation73_spill] sm:$0xff] %v3923_v31  ;;  %v1031_v31 = vld [vmem:[%s5179_s2 + $0x138] sm:$0xff] }
 0x130   :  { %1059 = vperm.xlu0 %3149, %v995_v25   ;;  %v1035_v5 = vld [vmem:[%s5179_s2 + $0x158] sm:$0xff] }
 0x131   :  { %1054 = vperm.xlu1 %3145, %v994_v20  }
 0x132   :  { %v3931_v23 = vpop.permute.xlu1 %537  ;;  %v3933_v24 = vpop.permute.xlu0 %849 }
 0x133   :  { %5259 = vst [vmem:[#allocation74_spill] sm:$0xff] %v3931_v23  ;;  %5260 = vst [vmem:[#allocation75_spill] sm:$0xff] %v3933_v24 }
 0x134   :  { %1069 = vperm.xlu0 %3149, %v997_v4  }
 0x135   :  { %1064 = vperm.xlu1 %3145, %v996_v30  }
 0x136   :  { %v3941_v25 = vpop.permute.xlu1 %545  ;;  %v3943_v20 = vpop.permute.xlu0 %857 }
 0x137   :  { %5261 = vst [vmem:[#allocation76_spill] sm:$0xff] %v3941_v25  ;;  %5262 = vst [vmem:[#allocation77_spill] sm:$0xff] %v3943_v20  ;;  %v1013_v25 = vld [vmem:[%s5179_s2 + $0xa8] sm:$0xff] }
 0x138   :  { %1079 = vperm.xlu0 %3149, %v999_v29  }
 0x139   :  { %1074 = vperm.xlu1 %3145, %v998_v19  }
 0x13a   :  { %v3951_v4 = vpop.permute.xlu1 %553  ;;  %v3953_v30 = vpop.permute.xlu0 %865 }
 0x13b   :  { %5263 = vst [vmem:[#allocation78_spill] sm:$0xff] %v3951_v4  ;;  %5264 = vst [vmem:[#allocation79_spill] sm:$0xff] %v3953_v30  ;;  %v1005_v30 = vld [vmem:[%s5179_s2 + $0x68] sm:$0xff]  ;;  %v1027_v4 = vld [vmem:[%s5179_s2 + $0x118] sm:$0xff] }
 0x13c   :  { %1089 = vperm.xlu0 %3149, %v1001_v3  }
 0x13d   :  { %1084 = vperm.xlu1 %3145, %v1000_v0  }
 0x13e   :  { %v3961_v29 = vpop.permute.xlu1 %561  ;;  %v3963_v19 = vpop.permute.xlu0 %877 }
 0x13f   :  { %5265 = vst [vmem:[#allocation80_spill] sm:$0xff] %v3961_v29  ;;  %5266 = vst [vmem:[#allocation81_spill] sm:$0xff] %v3963_v19  ;;  %v1004_v29 = vld [vmem:[%s5179_s2 + $0x60] sm:$0xff]  ;;  %v1007_v19 = vld [vmem:[%s5179_s2 + $0x78] sm:$0xff] }
 0x140   :  { %1099 = vperm.xlu0 %3149, %v1003_v28  }
 0x141   :  { %1094 = vperm.xlu1 %3145, %v1002_v18   ;;  %v1006_v18 = vld [vmem:[%s5179_s2 + $0x70] sm:$0xff] }
 0x142   :  { %v3971_v3 = vpop.permute.xlu1 %569  ;;  %v3973_v0 = vpop.permute.xlu0 %885 }
 0x143   :  { %5267 = vst [vmem:[#allocation82_spill] sm:$0xff] %v3971_v3  ;;  %5268 = vst [vmem:[#allocation83_spill] sm:$0xff] %v3973_v0  ;;  %v1025_v0 = vld [vmem:[%s5179_s2 + $0x108] sm:$0xff] }
 0x144   :  { %1109 = vperm.xlu0 %3149, %v1005_v30   ;;  %v1024_v30 = vld [vmem:[%s5179_s2 + $0x100] sm:$0xff] }
 0x145   :  { %1104 = vperm.xlu1 %3145, %v1004_v29  }
 0x146   :  { %v3981_v28 = vpop.permute.xlu1 %577 }
 0x147   :  { %5269 = vst [vmem:[#allocation84_spill] sm:$0xff] %v3981_v28  ;;  %v3986_v20 = vpop.permute.xlu0 %82  ;;  %v1009_v28 = vld [vmem:[%s5179_s2 + $0x88] sm:$0xff] }
 0x148   :  { %1119 = vperm.xlu0 %3149, %v1007_v19   ;;  %v1008_v19 = vld [vmem:[%s5179_s2 + $0x80] sm:$0xff] }
 0x149   :  { %1114 = vperm.xlu1 %3145, %v1006_v18  }
 0x14b   :  { %v3994_v29 = vpop.permute.xlu1 %689  ;;  %v3996_v3 = vpop.permute.xlu0 %87 }
 0x14c   :  { %1209 = vperm.xlu0 %3149, %v1025_v0   ;;  %v1026_v0 = vld [vmem:[%s5179_s2 + $0x110] sm:$0xff] }
 0x14d   :  { %1204 = vperm.xlu1 %3145, %v1024_v30  }
 0x14f   :  { %v4004_v18 = vpop.permute.xlu1 %697  ;;  %v4006_v63 = vpop.permute.xlu0 %102 }
 0x150   :  { %1129 = vperm.xlu0 %3149, %v1009_v28   ;;  %v1010_v28 = vld [vmem:[%s5179_s2 + $0x90] sm:$0xff] }
 0x151   :  { %1124 = vperm.xlu1 %3145, %v1008_v19  }
 0x153   :  { %v4014_v30 = vpop.permute.xlu1 %701  ;;  %v4016_v17 = vpop.permute.xlu0 %112 }
 0x154   :  { %1219 = vperm.xlu0 %3149, %v1027_v4   ;;  %v1028_v4 = vld [vmem:[%s5179_s2 + $0x120] sm:$0xff] }
 0x155   :  { %1214 = vperm.xlu1 %3145, %v1026_v0  }
 0x157   :  { %v4024_v19 = vpop.permute.xlu1 %709  ;;  %v4026_v24 = vpop.permute.xlu0 %122 }
 0x158   :  { %1139 = vperm.xlu0 %3149, %v1011_v1   ;;  %v1012_v1 = vld [vmem:[%s5179_s2 + $0xa0] sm:$0xff] }
 0x159   :  { %1134 = vperm.xlu1 %3145, %v1010_v28  }
 0x15b   :  { %v4034_v0 = vpop.permute.xlu1 %717  ;;  %v4036_v62 = vpop.permute.xlu0 %132 }
 0x15c   :  { %1229 = vperm.xlu0 %3149, %v1029_v60   ;;  %v1030_v60 = vld [vmem:[%s5179_s2 + $0x130] sm:$0xff] }
 0x15d   :  { %1224 = vperm.xlu1 %3145, %v1028_v4  }
 0x15f   :  { %v4044_v28 = vpop.permute.xlu1 %725  ;;  %v4046_v16 = vpop.permute.xlu0 %142 }
 0x160   :  { %1149 = vperm.xlu0 %3149, %v1013_v25   ;;  %v1014_v25 = vld [vmem:[%s5179_s2 + $0xb0] sm:$0xff] }
 0x161   :  { %1144 = vperm.xlu1 %3145, %v1012_v1  }
 0x163   :  { %v4054_v4 = vpop.permute.xlu1 %733  ;;  %v4056_v57 = vpop.permute.xlu0 %152 }
 0x164   :  { %5270 = vst [vmem:[#allocation85_spill] sm:$0xff] %v4056_v57  ;;  %1239 = vperm.xlu0 %3149, %v1031_v31   ;;  %v1032_v31 = vld [vmem:[%s5179_s2 + $0x140] sm:$0xff] }
 0x165   :  { %1234 = vperm.xlu1 %3145, %v1030_v60  }
 0x167   :  { %v4064_v1 = vpop.permute.xlu1 %741  ;;  %v4066_v23 = vpop.permute.xlu0 %162 }
 0x168   :  { %5271 = vst [vmem:[#allocation86_spill] sm:$0xff] %v4066_v23  ;;  %1159 = vperm.xlu0 %3149, %v1015_v52   ;;  %v1016_v52 = vld [vmem:[%s5179_s2 + $0xc0] sm:$0xff]  ;;  %v5315_v23 = vld [vmem:[#allocation19_spill] sm:$0xff] }
 0x169   :  { %1154 = vperm.xlu1 %3145, %v1014_v25  }
 0x16b   :  { %v4074_v60 = vpop.permute.xlu1 %749  ;;  %v4076_v26 = vpop.permute.xlu0 %172 }
 0x16c   :  { %5272 = vst [vmem:[#allocation87_spill] sm:$0xff] %v4074_v60  ;;  %5273 = vst [vmem:[#allocation88_spill] sm:$0xff] %v4076_v26  ;;  %1249 = vperm.xlu0 %3149, %v1033_v15   ;;  %v1034_v15 = vld [vmem:[%s5179_s2 + $0x150] sm:$0xff]  ;;  %v5318_v60 = vld [vmem:[#allocation22_spill] sm:$0xff] }
 0x16d   :  { %1244 = vperm.xlu1 %3145, %v1032_v31  }
 0x16f   :  { %v4084_v25 = vpop.permute.xlu1 %757  ;;  %v4086_v54 = vpop.permute.xlu0 %182 }
 0x170   :  { %5274 = vst [vmem:[#allocation89_spill] sm:$0xff] %v4084_v25  ;;  %5275 = vst [vmem:[#allocation90_spill] sm:$0xff] %v4086_v54  ;;  %1169 = vperm.xlu0 %3149, %v1017_v59   ;;  %v1019_v54 = vld [vmem:[%s5179_s2 + $0xd8] sm:$0xff]  ;;  %v1018_v59 = vld [vmem:[%s5179_s2 + $0xd0] sm:$0xff] }
 0x171   :  { %1164 = vperm.xlu1 %3145, %v1016_v52  }
 0x173   :  { %v4094_v31 = vpop.permute.xlu1 %765  ;;  %v4096_v14 = vpop.permute.xlu0 %192 }
 0x174   :  { %5276 = vst [vmem:[#allocation91_spill] sm:$0xff] %v4094_v31  ;;  %5277 = vst [vmem:[#allocation92_spill] sm:$0xff] %v4096_v14  ;;  %1259 = vperm.xlu0 %3149, %v1035_v5   ;;  %v1020_v14 = vld [vmem:[%s5179_s2 + $0xe0] sm:$0xff]  ;;  %v1022_v31 = vld [vmem:[%s5179_s2 + $0xf0] sm:$0xff] }
 0x175   :  { %1254 = vperm.xlu1 %3145, %v1034_v15  }
 0x177   :  { %v4104_v52 = vpop.permute.xlu1 %773  ;;  %v4106_v2 = vpop.permute.xlu0 %202 }
 0x178   :  { %5278 = vst [vmem:[#allocation93_spill] sm:$0xff] %v4104_v52  ;;  %5279 = vst [vmem:[#allocation94_spill] sm:$0xff] %v4106_v2  ;;  %1179 = vperm.xlu0 %3149, %v1019_v54   ;;  %v330_v52 = vlaneseq }
 0x179   :  { %1174 = vperm.xlu1 %3145, %v1018_v59   ;;  %v1036_v59 = vld [vmem:[%s5179_s2 + $0x160] sm:$0xff] }
 0x17b   :  { %v4111_v5 = vpop.permute.xlu1 %781  ;;  %v4113_v15 = vpop.permute.xlu0 %212 }
 0x17c   :  { %5280 = vst [vmem:[#allocation95_spill] sm:$0xff] %v4111_v5  ;;  %5281 = vst [vmem:[#allocation96_spill] sm:$0xff] %v4113_v15  ;;  %1184 = vperm.xlu0 %3149, %v1020_v14   ;;  %v1041_v14 = vld [vmem:[%s5179_s2 + $0x188] sm:$0xff] }
 0x17d   :  { %3146 = vset.pattern.permute.xlu1 %v5220_v27 }
 0x17e   :  { %873 = vperm.xlu1 %3146, %v3742_v38   ;;  %v1037_v38 = vld [vmem:[%s5179_s2 + $0x168] sm:$0xff] }
 0x17f   :  { %v4120_v2 = vpop.permute.xlu1 %789  ;;  %v4122_v54 = vpop.permute.xlu0 %222 }
 0x180   :  { %5282 = vst [vmem:[#allocation97_spill] sm:$0xff] %v4120_v2  ;;  %5283 = vst [vmem:[#allocation98_spill] sm:$0xff] %v4122_v54  ;;  %1194 = vperm.xlu0 %3149, %v1022_v31   ;;  %v1544_v31 = vld [vmem:[%s5181_s4 + $0x8] sm:$0xff] }
 0x182   :  { %3147 = vset.pattern.permute.xlu1 %v5217_v37 }
 0x183   :  { %1264 = vperm.xlu1 %3147, %v1036_v59   ;;  %v4131_v15 = vpop.permute.xlu1 %797  ;;  %v4133_v5 = vpop.permute.xlu0 %232  ;;  %v1021_v59 = vld [vmem:[%s5179_s2 + $0xe8] sm:$0xff] }
 0x184   :  { %5284 = vst [vmem:[#allocation99_spill] sm:$0xff] %v4131_v15  ;;  %5285 = vst [vmem:[#allocation100_spill] sm:$0xff] %v4133_v5  ;;  %1289 = vperm.xlu0 %3149, %v1041_v14   ;;  %v1546_v14 = vld [vmem:[%s5181_s4 + $0x18] sm:$0xff] }
 0x187   :  { %1269 = vperm.xlu1 %3147, %v1037_v38   ;;  %v4141_v54 = vpop.permute.xlu1 %805  ;;  %v4143_v2 = vpop.permute.xlu0 %242  ;;  %v1548_v38 = vld [vmem:[%s5181_s4 + $0x28] sm:$0xff] }
 0x188   :  { %5286 = vst [vmem:[#allocation101_spill] sm:$0xff] %v4141_v54  ;;  %5287 = vst [vmem:[#allocation102_spill] sm:$0xff] %v4143_v2  ;;  %1588 = vperm.xlu0 %3149, %v1544_v31  }
 0x18b   :  { %1189 = vperm.xlu1 %3147, %v1021_v59   ;;  %v4151_v5 = vpop.permute.xlu1 %813  ;;  %v4153_v15 = vpop.permute.xlu0 %252  ;;  %v1550_v59 = vld [vmem:[%s5181_s4 + $0x38] sm:$0xff] }
 0x18c   :  { %5288 = vst [vmem:[#allocation103_spill] sm:$0xff] %v4151_v5  ;;  %5289 = vst [vmem:[#allocation104_spill] sm:$0xff] %v4153_v15  ;;  %1598 = vperm.xlu0 %3149, %v1546_v14   ;;  %v1038_v14 = vld [vmem:[%s5179_s2 + $0x170] sm:$0xff]  ;;  %v5301_v15 = vld [vmem:[#allocation9_spill] sm:$0xff] }
 0x18f   :  { %3148 = vset.pattern.permute.xlu1 %v5220_v27  ;;  %v4159_v31 = vpop.permute.xlu1 %821  ;;  %v4161_v54 = vpop.permute.xlu0 %262  ;;  %v331_v27 = vshrl.u32 %v330_v52, 7  ;;  %v29_v52 = vld [vmem:[%s5177_s0] sm:$0x7]  ;;  %s2957_s0 = sshll.u32 %s3292_s23, 4  ;;  %s2958_s0 = int_to_ptr.vmem [resolvable:$true] %s2957_s0 }
 0x190   :  { %5290 = vst [vmem:[#allocation105_spill] sm:$0xff] %v4159_v31  ;;  %5291 = vst [vmem:[#allocation106_spill] sm:$0xff] %v4161_v54  ;;  %881 = vperm.xlu1 %3148, %v3753_v56   ;;  %1608 = vperm.xlu0 %3149, %v1548_v38   ;;  %v1552_v56 = vld [vmem:[%s5181_s4 + $0x48] sm:$0xff]  ;;  %v1039_v54 = vld [vmem:[%s5179_s2 + $0x178] sm:$0xff]  ;;  %s3265_s24 = scalar_lea.vmem %s2958_s0, 16  ;;  %s3269_s25 = scalar_lea.vmem %s2958_s0, 32 }
 0x191   :  { %v586_v38 = vsub.s32 1, %v331_v27  ;;  %v890_v26 = vsub.s32 2, %v331_v27  ;;  %p3266_p0 = scmp.ne.s32.totalorder %s2958_s0, %s3265_s24  ;;  %p3270_p1 = scmp.lt.s32.totalorder %s2958_s0, %s2958_s0 }
 0x192   :  { %p3271_p2 = scmp.lt.s32.totalorder %s3269_s25, %s3265_s24 }
 0x193   :  { %v4170_v5 = vpop.permute.xlu1 %829  ;;  %v4172_v22 = vpop.permute.xlu0 %272  ;;  %v4243_v21 = vrot.slane %v29_v52, %v890_v26  ;;  %v5306_v26 = vld [vmem:[#allocation10_spill] sm:$0xff] }
 0x194   :  { %5292 = vst [vmem:[#allocation107_spill] sm:$0xff] %v4170_v5  ;;  %5293 = vst [vmem:[#allocation108_spill] sm:$0xff] %v4172_v22  ;;  %3150 = vset.pattern.permute.xlu1 %v5217_v37  ;;  %1618 = vperm.xlu0 %3149, %v1550_v59   ;;  %v332_v5 = vsub.s32 0, %v331_v27  ;;  %v1554_v59 = vld [vmem:[%s5181_s4 + $0x58] sm:$0xff]  ;;  %p3272_p3 = por %p3271_p2, %p3270_p1 }
 0x195   :  { %1274 = vperm.xlu1 %3150, %v1038_v14   ;;  %v4191_v14 = vrot.slane %v29_v52, %v586_v38  ;;  %v1023_v22 = vld [vmem:[%s5179_s2 + $0xf8] sm:$0xff] }
 0x196   :  { %p3273_p4 = pnand %p3272_p3, %p3266_p0 }
 0x197   :  { %v4181_v51 = vpop.permute.xlu1 %837  ;;  %v4183_v53 = vpop.permute.xlu0 %282  ;;  %v591_v58 = vmul.f32 %v4191_v14, %v3586_v41  ;;  %v597_v41 = vmul.f32 %v4191_v14, %v3619_v50  ;;  %v599_v25 = vmul.f32 %v4191_v14, %v5301_v15  ;;  %v5303_v50 = vld [vmem:[#allocation7_spill] sm:$0xff]  ;;  %v1543_v15 = vld [vmem:[%s5181_s4] sm:$0xff]  ;;  %v609_v61 = vmul.f32 %v4191_v14, %v5315_v23 }
 0x198   :  { %5294 = vst [vmem:[#allocation109_spill] sm:$0xff] %v4181_v51  ;;  %5295 = vst [vmem:[#allocation110_spill] sm:$0xff] %v4183_v53  ;;  %1628 = vperm.xlu0 %3149, %v1552_v56   ;;  %v4200_v56 = vrot.slane %v29_v52, %v332_v5  ;;  %v593_v5 = vmul.f32 %v4191_v14, %v3597_v44  ;;  %v5300_v44 = vld [vmem:[#allocation8_spill] sm:$0xff] }
 0x199   :  { %1279 = vperm.xlu1 %3150, %v1039_v54   ;;  %v1556_v54 = vld [vmem:[%s5181_s4 + $0x68] sm:$0xff] }
 0x19a   :  { %v337_v38 = vmul.f32 %v4200_v56, %v3584_v40  ;;  %v341_v27 = vmul.f32 %v4200_v56, %v3606_v46  ;;  %v343_v40 = vmul.f32 %v4200_v56, %v3617_v49  ;;  %v345_v13 = vmul.f32 %v4200_v56, %v5300_v44  ;;  %v1558_v46 = vld [vmem:[%s5181_s4 + $0x78] sm:$0xff] }
 0x19b   :  { %v4196_v51 = vpop.permute.xlu1 %845  ;;  %v4198_v53 = vpop.permute.xlu0 %292  ;;  %v347_v52 = vmul.f32 %v4200_v56, %v5306_v26  ;;  %v1560_v26 = vld [vmem:[%s5181_s4 + $0x88] sm:$0xff]  ;;  %v359_v45 = vmul.f32 %v4200_v56, %v5318_v60 }
 0x19c   :  { %5296 = vst [vmem:[#allocation111_spill] sm:$0xff] %v4196_v51  ;;  %5297 = vst [vmem:[#allocation112_spill] sm:$0xff] %v4198_v53  ;;  %1638 = vperm.xlu0 %3149, %v1554_v59   ;;  %v339_v51 = vmul.f32 %v4200_v56, %v3595_v43  ;;  %v595_v59 = vmul.f32 %v4191_v14, %v3608_v47  ;;  %v5302_v47 = vld [vmem:[#allocation6_spill] sm:$0xff]  ;;  %v4252_v44 = vadd.f32 %v597_v41, %v343_v40  ;;  %v3156_v60 = vld [vmem:[%s5180_s3 + $0xc] ss:$16 sps:$4 sm:$0xff]  }
 0x19d   :  { %1199 = vperm.xlu1 %3150, %v1023_v22   ;;  %v1040_v22 = vld [vmem:[%s5179_s2 + $0x180] sm:$0xff]  ;;  %v4237_v49 = vmul.f32 %v4200_v56, %v5302_v47  ;;  %v335_v47 = vmul.f32 %v4200_v56, %v3996_v3  ;;  %3041 = vmatprep.mubr.msk.bf16.mxu0 %vm2132_vm0, %v3156_v60 }
 0x19e   :  { %v5309_v3 = vld [vmem:[#allocation13_spill] sm:$0xff]  ;;  %v5310_v41 = vld [vmem:[#allocation14_spill] sm:$0xff] }
 0x19f   :  { %v4224_v43 = vpop.permute.xlu1 %853  ;;  %v4226_v53 = vpop.permute.xlu0 %302  ;;  %v603_v40 = vmul.f32 %v4191_v14, %v5309_v3 }
 0x1a0   :  { %5298 = vst [vmem:[#allocation113_spill] sm:$0xff] %v4224_v43  ;;  %5299 = vst [vmem:[#allocation114_spill] sm:$0xff] %v4226_v53  ;;  %1648 = vperm.xlu0 %3149, %v1556_v54   ;;  %v588_v43 = vmul.f32 %v4191_v14, %v5303_v50  ;;  %v4241_v53 = vadd.f32 %v591_v58, %v337_v38  ;;  %v4248_v54 = vadd.f32 %v593_v5, %v339_v51  ;;  %v5307_v38 = vld [vmem:[#allocation11_spill] sm:$0xff] }
 0x1a1   :  { %1284 = vperm.xlu1 %3150, %v1040_v22   ;;  %v4250_v22 = vadd.f32 %v595_v59, %v341_v27  ;;  %v4260_v58 = vadd.f32 %v599_v25, %v345_v13  ;;  %v601_v51 = vmul.f32 %v4191_v14, %v5307_v38  ;;  %v334_v5 = vmul.f32 %v4200_v56, %v3986_v20  ;;  %v5308_v27 = vld [vmem:[#allocation12_spill] sm:$0xff] }
 0x1a2   :  { %v349_v59 = vmul.f32 %v4200_v56, %v5308_v27  ;;  %v351_v13 = vmul.f32 %v4200_v56, %v5310_v41  ;;  %v589_v25 = vmul.f32 %v4191_v14, %v3805_v32  ;;  %v3153_v20 = vld [vmem:[%s5180_s3 + $0x4] ss:$16 sps:$4 sm:$0xff]   ;;  %v892_v32 = vmul.f32 %v4243_v21, %v3994_v29  ;;  %v5317_v29 = vld [vmem:[#allocation21_spill] sm:$0xff] }
 0x1a3   :  { %v4256_v48 = vpop.permute.xlu1 %861  ;;  %v4258_v50 = vpop.permute.xlu0 %312  ;;  %v5312_v27 = vld [vmem:[#allocation16_spill] sm:$0xff]  ;;  %2222 = vmatprep.mubr.bf16.mxu1 %v3153_v20  ;;  %v611_v2 = vmul.f32 %v4191_v14, %v5317_v29  ;;  %v638_v57 = vadd.f32 %v588_v43, %v334_v5  ;;  %v4309_v23 = vadd.f32 %v601_v51, %v347_v52  ;;  %v894_v5 = vmul.f32 %v4243_v21, %v4004_v18 }
 0x1a4   :  { %5304 = vst [vmem:[#allocation8_spill] sm:$0xff] %v4256_v48  ;;  %5305 = vst [vmem:[#allocation9_spill] sm:$0xff] %v4258_v50  ;;  %1658 = vperm.xlu0 %3149, %v1558_v46   ;;  %v5311_v46 = vld [vmem:[#allocation15_spill] sm:$0xff]  ;;  %v353_v3 = vmul.f32 %v4200_v56, %v5312_v27  ;;  %v5313_v50 = vld [vmem:[#allocation17_spill] sm:$0xff]  ;;  %v639_v27 = vadd.f32 %v589_v25, %v335_v47  ;;  %v893_v47 = vmul.f32 %v4243_v21, %v3807_v6 }
 0x1a5   :  { %1583 = vperm.xlu1 %3150, %v1543_v15   ;;  %v605_v38 = vmul.f32 %v4191_v14, %v5311_v46  ;;  %v607_v41 = vmul.f32 %v4191_v14, %v5313_v50  ;;  %v1545_v15 = vld [vmem:[%s5181_s4 + $0x10] sm:$0xff]  ;;  %v5314_v48 = vld [vmem:[#allocation18_spill] sm:$0xff]  ;;  %v590_v25 = vmul.f32 %v4191_v14, %v3811_v33  ;;  %v1562_v20 = vld [vmem:[%s5181_s4 + $0x98] sm:$0xff]  ;;  %v895_v6 = vmul.f32 %v4243_v21, %v4014_v30 }
 0x1a6   :  { %v355_v31 = vmul.f32 %v4200_v56, %v5314_v48  ;;  %v5316_v46 = vld [vmem:[#allocation20_spill] sm:$0xff]  ;;  %v613_v48 = vmul.f32 %v4191_v14, %v5319_v11  ;;  %v4321_v11 = vadd.f32 %v603_v40, %v349_v59  ;;  %v942_v52 = vadd.f32 %v892_v32, %v638_v57  ;;  %v1547_v33 = vld [vmem:[%s5181_s4 + $0x20] sm:$0xff] }
 0x1a7   :  { %v357_v12 = vmul.f32 %v4200_v56, %v5316_v46  ;;  %v4299_v55 = vpop.permute.xlu1 %869  ;;  %v4301_v50 = vpop.permute.xlu0 %322  ;;  %v4323_v43 = vadd.f32 %v605_v38, %v351_v13  ;;  %v4330_v51 = vadd.f32 %v607_v41, %v353_v3  ;;  %v943_v40 = vadd.f32 %v893_v47, %v639_v27  ;;  %v5320_v3 = vld [vmem:[#allocation24_spill] sm:$0xff] }
 0x1a8   :  { %1668 = vperm.xlu0 %3149, %v1560_v26   ;;  %v338_v26 = vmul.f32 %v4200_v56, %v4006_v63  ;;  %v4337_v13 = vadd.f32 %v609_v61, %v355_v31  ;;  %v4341_v57 = vadd.f32 %v613_v48, %v359_v45  ;;  %v4345_v41 = vmul.f32 %v4200_v56, %v5320_v3  ;;  %v1551_v3 = vld [vmem:[%s5181_s4 + $0x40] sm:$0xff] }
 0x1a9   :  { %1593 = vperm.xlu1 %3150, %v1545_v15   ;;  %v4339_v30 = vadd.f32 %v611_v2, %v357_v12  ;;  %v640_v18 = vadd.f32 %v590_v25, %v4237_v49  ;;  %v592_v63 = vmul.f32 %v4191_v14, %v3817_v34  ;;  %v1564_v2 = vld [vmem:[%s5181_s4 + $0xa8] sm:$0xff]  ;;  %v340_v12 = vmul.f32 %v4200_v56, %v4016_v17  ;;  %v1549_v49 = vld [vmem:[%s5181_s4 + $0x30] sm:$0xff] }
 0x1aa   :  { %v897_v45 = vmul.f32 %v4243_v21, %v4024_v19  ;;  %v945_v31 = vadd.f32 %v895_v6, %v4241_v53  ;;  %v5321_v34 = vld [vmem:[#allocation30_spill] sm:$0xff]  ;;  %v5322_v25 = vld [vmem:[#allocation31_spill] sm:$0xff]  ;;  %v594_v19 = vmul.f32 %v4191_v14, %v3823_v35  ;;  %v5323_v6 = vld [vmem:[#allocation25_spill] sm:$0xff]  ;;  %v899_v35 = vmul.f32 %v4243_v21, %v4034_v0 }
 0x1ab   :  { %v1045_v59 = vpop.permute.xlu0 %1044  ;;  %v367_v46 = vmul.f32 %v4200_v56, %v5321_v34  ;;  %v642_v27 = vadd.f32 %v592_v63, %v338_v26  ;;  %v944_v47 = vadd.f32 %v894_v5, %v640_v18  ;;  %v621_v17 = vmul.f32 %v4191_v14, %v5322_v25  ;;  %v1566_v5 = vld [vmem:[%s5181_s4 + $0xb8] sm:$0xff] }
 0x1ac   :  { %v1292_v38 = vadd.f32 %v1045_v59, %v942_v52  ;;  %v1050_v32 = vpop.permute.xlu1 %1049  ;;  %1678 = vperm.xlu0 %3149, %v1562_v20   ;;  %v4369_v52 = vmul.f32 %v4191_v14, %v5323_v6 }
 0x1ad   :  { %v1293_v15 = vadd.f32 %v1050_v32, %v943_v40  ;;  %1603 = vperm.xlu1 %3150, %v1547_v33   ;;  %v896_v33 = vmul.f32 %v4243_v21, %v3813_v7  ;;  %v644_v40 = vadd.f32 %v594_v19, %v340_v12  ;;  %v342_v7 = vmul.f32 %v4200_v56, %v4026_v24  ;;  %v1568_v24 = vld [vmem:[%s5181_s4 + $0xc8] sm:$0xff] }
 0x1ae   :  { %v1342_v61 = vmul.f32 0.01, %v1292_v38 }
 0x1af   :  { %v1343_v29 = vmul.f32 0.01, %v1293_v15  ;;  %v1060_v48 = vpop.permute.xlu0 %1059 }
 0x1b0   :  { %v1295_v20 = vadd.f32 %v1060_v48, %v945_v31  ;;  %v1055_v60 = vpop.permute.xlu1 %1054  ;;  %1688 = vperm.xlu0 %3149, %v1564_v2   ;;  %v1392_v53 = vmax.f32 %v1292_v38, %v1342_v61  ;;  %v947_v38 = vadd.f32 %v897_v45, %v4248_v54  ;;  %v946_v2 = vadd.f32 %v896_v33, %v642_v27 }
 0x1b1   :  { %v1294_v26 = vadd.f32 %v1055_v60, %v944_v47  ;;  %1613 = vperm.xlu1 %3150, %v1549_v49   ;;  %v1393_v59 = vmax.f32 %v1293_v15, %v1343_v29  ;;  %v4384_v31 = vadd.f32 %v621_v17, %v367_v46  ;;  %v898_v15 = vmul.f32 %v4243_v21, %v3819_v8 }
 0x1b2   :  { %v1345_v32 = vmul.f32 0.01, %v1295_v20  ;;  %v596_v54 = vmul.f32 %v4191_v14, %v3829_v36  ;;  %v901_v46 = vmul.f32 %v4243_v21, %v4044_v28  ;;  %v949_v8 = vadd.f32 %v899_v35, %v4250_v22  ;;  %v1553_v36 = vld [vmem:[%s5181_s4 + $0x50] sm:$0xff] }
 0x1b3   :  { %v1344_v18 = vmul.f32 0.01, %v1294_v26  ;;  %v1070_v63 = vpop.permute.xlu0 %1069  ;;  %v1518_v61 = vpack.c.bf16 %v1393_v59, %v1392_v53  ;;  %v948_v29 = vadd.f32 %v898_v15, %v644_v40  ;;  %v344_v47 = vmul.f32 %v4200_v56, %v4036_v62  ;;  %v1570_v62 = vld [vmem:[%s5181_s4 + $0xd8] sm:$0xff] }
 0x1b4   :  { %v1395_v0 = vmax.f32 %v1295_v20, %v1345_v32  ;;  %v1297_v12 = vadd.f32 %v1070_v63, %v947_v38  ;;  %v1065_v49 = vpop.permute.xlu1 %1064  ;;  %1698 = vperm.xlu0 %3149, %v1566_v5   ;;  %v646_v48 = vadd.f32 %v596_v54, %v342_v7  ;;  %v5324_v20 = vld [vmem:[#allocation32_spill] sm:$0xff]  ;;  %v900_v22 = vmul.f32 %v4243_v21, %v3825_v9  ;;  %v5325_v63 = vld [vmem:[#allocation33_spill] sm:$0xff] }
 0x1b5   :  { %v1394_v45 = vmax.f32 %v1294_v26, %v1344_v18  ;;  %v1296_v34 = vadd.f32 %v1065_v49, %v946_v2  ;;  %1623 = vperm.xlu1 %3150, %v1551_v3   ;;  %2191 = vmatpush1.bf16.msra.mxu1 %v1518_v61  ;;  %v369_v28 = vmul.f32 %v4200_v56, %v5324_v20  ;;  %v1572_v49 = vld [vmem:[%s5181_s4 + $0xe8] sm:$0xff] }
 0x1b6   :  { %v1347_v27 = vmul.f32 0.01, %v1297_v12  ;;  %2192 = vmatprep.subr.bf16.mxu1 %v5217_v37  ;;  %v598_v33 = vmul.f32 %v4191_v14, %v3835_v39  ;;  %v346_v59 = vmul.f32 %v4200_v56, %v4046_v16  ;;  %v903_v9 = vmul.f32 %v4243_v21, %v4054_v4  ;;  %v1555_v39 = vld [vmem:[%s5181_s4 + $0x60] sm:$0xff] }
 0x1b7   :  { %v1346_v25 = vmul.f32 0.01, %v1296_v34  ;;  %v1080_v17 = vpop.permute.xlu0 %1079  ;;  %v1519_v19 = vpack.c.bf16 %v1395_v0, %v1394_v45  ;;  %v951_v35 = vadd.f32 %v901_v46, %v4252_v44  ;;  %v950_v7 = vadd.f32 %v900_v22, %v646_v48 }
 0x1b8   :  { %v1397_v60 = vmax.f32 %v1297_v12, %v1347_v27  ;;  %v1299_v53 = vadd.f32 %v1080_v17, %v949_v8  ;;  %v1075_v6 = vpop.permute.xlu1 %1074  ;;  %1708 = vperm.xlu0 %3149, %v1568_v24   ;;  %v648_v32 = vadd.f32 %v598_v33, %v344_v47  ;;  %v623_v16 = vmul.f32 %v4191_v14, %v5325_v63  ;;  %v5326_v24 = vld [vmem:[#allocation85_spill] sm:$0xff]  ;;  %v5327_v47 = vld [vmem:[#allocation48_spill] sm:$0xff] }
 0x1b9   :  { %v1396_v26 = vmax.f32 %v1296_v34, %v1346_v25  ;;  %v1298_v5 = vadd.f32 %v1075_v6, %v948_v29  ;;  %1633 = vperm.xlu1 %3150, %v1553_v36   ;;  %2193 = vmatpush1.bf16.msra.mxu1 %v1519_v19  ;;  %v600_v4 = vmul.f32 %v4191_v14, %v3841_v42  ;;  %v5328_v19 = vld [vmem:[#allocation50_spill] sm:$0xff] }
 0x1ba   :  { %v1349_v40 = vmul.f32 0.01, %v1299_v53  ;;  %2194 = vmatprep.subr.bf16.mxu1 %v5217_v37  ;;  %v902_v15 = vmul.f32 %v4243_v21, %v3831_v10  ;;  %v905_v45 = vmul.f32 %v4243_v21, %v4064_v1  ;;  %v953_v34 = vadd.f32 %v903_v9, %v4260_v58  ;;  %v1557_v10 = vld [vmem:[%s5181_s4 + $0x70] sm:$0xff]  ;;  %v5330_v9 = vld [vmem:[#allocation102_spill] sm:$0xff] }
 0x1bb   :  { %v1348_v38 = vmul.f32 0.01, %v1298_v5  ;;  %v1090_v3 = vpop.permute.xlu0 %1089  ;;  %v1520_v18 = vpack.c.bf16 %v1397_v60, %v1396_v26  ;;  %v650_v54 = vadd.f32 %v600_v4, %v346_v59  ;;  %v348_v46 = vmul.f32 %v4200_v56, %v5326_v24  ;;  %v5333_v4 = vld [vmem:[#allocation68_spill] sm:$0xff] }
 0x1bc   :  { %v1399_v2 = vmax.f32 %v1299_v53, %v1349_v40  ;;  %v1301_v61 = vadd.f32 %v1090_v3, %v951_v35  ;;  %v1085_v44 = vpop.permute.xlu1 %1084  ;;  %1718 = vperm.xlu0 %3149, %v1570_v62   ;;  %v952_v29 = vadd.f32 %v902_v15, %v648_v32  ;;  %v4438_v48 = vadd.f32 %v623_v16, %v369_v28  ;;  %v1574_v53 = vld [vmem:[%s5181_s4 + $0xf8] sm:$0xff]  ;;  %v5329_v28 = vld [vmem:[#allocation87_spill] sm:$0xff]  ;;  %v1559_v62 = vld [vmem:[%s5181_s4 + $0x80] sm:$0xff] }
 0x1bd   :  { %v1398_v0 = vmax.f32 %v1298_v5, %v1348_v38  ;;  %v1300_v12 = vadd.f32 %v1085_v44, %v950_v7  ;;  %1643 = vperm.xlu1 %3150, %v1555_v39   ;;  %2195 = vmatpush1.bf16.msra.mxu1 %v1520_v18  ;;  %v904_v1 = vmul.f32 %v4243_v21, %v5327_v47  ;;  %v5331_v38 = vld [vmem:[#allocation34_spill] sm:$0xff]  ;;  %v5332_v7 = vld [vmem:[#allocation49_spill] sm:$0xff]  ;;  %v5337_v47 = vld [vmem:[#allocation52_spill] sm:$0xff] }
 0x1be   :  { %v1351_v42 = vmul.f32 0.01, %v1301_v61  ;;  %2196 = vmatprep.subr.bf16.mxu1 %v5217_v37  ;;  %v602_v20 = vmul.f32 %v4191_v14, %v5328_v19  ;;  %v907_v6 = vmul.f32 %v4243_v21, %v5329_v28  ;;  %v955_v26 = vadd.f32 %v905_v45, %v4309_v23  ;;  %v1576_v15 = vld [vmem:[%s5181_s4 + $0x108] sm:$0xff]  ;;  %v5339_v28 = vld [vmem:[#allocation89_spill] sm:$0xff] }
 0x1bf   :  { %v1350_v27 = vmul.f32 0.01, %v1300_v12  ;;  %v1100_v8 = vpop.permute.xlu0 %1099  ;;  %v1521_v36 = vpack.c.bf16 %v1399_v2, %v1398_v0  ;;  %v954_v5 = vadd.f32 %v904_v1, %v650_v54  ;;  %v366_v40 = vmul.f32 %v4200_v56, %v5330_v9  ;;  %v5334_v0 = vld [vmem:[#allocation86_spill] sm:$0xff] }
 0x1c0   :  { %v1401_v25 = vmax.f32 %v1301_v61, %v1351_v42  ;;  %v1303_v58 = vadd.f32 %v1100_v8, %v953_v34  ;;  %v1095_v17 = vpop.permute.xlu1 %1094  ;;  %1728 = vperm.xlu0 %3149, %v1572_v49   ;;  %v652_v59 = vadd.f32 %v602_v20, %v348_v46  ;;  %v371_v3 = vmul.f32 %v4200_v56, %v5331_v38  ;;  %v5335_v49 = vld [vmem:[#allocation105_spill] sm:$0xff]  ;;  %v1561_v34 = vld [vmem:[%s5181_s4 + $0x90] sm:$0xff] }
 0x1c1   :  { %v1400_v22 = vmax.f32 %v1300_v12, %v1350_v27  ;;  %v1302_v60 = vadd.f32 %v1095_v17, %v952_v29  ;;  %1653 = vperm.xlu1 %3150, %v1557_v10   ;;  %2197 = vmatpush1.bf16.msra.mxu1 %v1521_v36  ;;  %v906_v23 = vmul.f32 %v4243_v21, %v5332_v7  ;;  %v5336_v29 = vld [vmem:[#allocation35_spill] sm:$0xff] }
 0x1c2   :  { %v1353_v33 = vmul.f32 0.01, %v1303_v58  ;;  %2198 = vmatprep.subr.bf16.mxu1 %v5217_v37  ;;  %v620_v2 = vmul.f32 %v4191_v14, %v5333_v4  ;;  %v350_v12 = vmul.f32 %v4200_v56, %v5334_v0  ;;  %v925_v54 = vmul.f32 %v4243_v21, %v5335_v49  ;;  %v5338_v17 = vld [vmem:[#allocation67_spill] sm:$0xff] }
 0x1c3   :  { %v1352_v35 = vmul.f32 0.01, %v1302_v60  ;;  %v1110_v39 = vpop.permute.xlu0 %1109  ;;  %v1522_v32 = vpack.c.bf16 %v1401_v25, %v1400_v22  ;;  %v957_v42 = vadd.f32 %v907_v6, %v4321_v11  ;;  %v956_v27 = vadd.f32 %v906_v23, %v652_v59  ;;  %v5341_v38 = vld [vmem:[#allocation51_spill] sm:$0xff] }
 0x1c4   :  { %v1403_v18 = vmax.f32 %v1303_v58, %v1353_v33  ;;  %v1305_v63 = vadd.f32 %v1110_v39, %v955_v26  ;;  %v1105_v16 = vpop.permute.xlu1 %1104  ;;  %1738 = vperm.xlu0 %3149, %v1574_v53   ;;  %v670_v10 = vadd.f32 %v620_v2, %v366_v40  ;;  %v625_v36 = vmul.f32 %v4191_v14, %v5336_v29 }
 0x1c5   :  { %v1402_v61 = vmax.f32 %v1302_v60, %v1352_v35  ;;  %v1304_v44 = vadd.f32 %v1105_v16, %v954_v5  ;;  %1663 = vperm.xlu1 %3150, %v1559_v62   ;;  %2199 = vmatpush1.bf16.msra.mxu1 %v1522_v32  ;;  %v604_v1 = vmul.f32 %v4191_v14, %v5337_v47  ;;  %v1578_v60 = vld [vmem:[%s5181_s4 + $0x118] sm:$0xff]  ;;  %v1563_v5 = vld [vmem:[%s5181_s4 + $0xa0] sm:$0xff] }
 0x1c6   :  { %v1355_v45 = vmul.f32 0.01, %v1305_v63  ;;  %2200 = vmatprep.subr.bf16.mxu1 %v5217_v37  ;;  %v924_v19 = vmul.f32 %v4243_v21, %v5338_v17  ;;  %v909_v6 = vmul.f32 %v4243_v21, %v5339_v28  ;;  %v975_v26 = vadd.f32 %v925_v54, %v4384_v31  ;;  %v5340_v62 = vld [vmem:[#allocation104_spill] sm:$0xff]  ;;  %v1567_v28 = vld [vmem:[%s5181_s4 + $0xc0] sm:$0xff] }
 0x1c7   :  { %v1354_v24 = vmul.f32 0.01, %v1304_v44  ;;  %v1120_v46 = vpop.permute.xlu0 %1119  ;;  %v1523_v8 = vpack.c.bf16 %v1403_v18, %v1402_v61  ;;  %v654_v53 = vadd.f32 %v604_v1, %v350_v12  ;;  %v368_v59 = vmul.f32 %v4200_v56, %v5340_v62  ;;  %v2636_v61 = vld [vmem:[%s5182_s5] sm:$0xff]  ;;  %v1565_v54 = vld [vmem:[%s5181_s4 + $0xb0] sm:$0xff] }
 0x1c8   :  { %v1405_v25 = vmax.f32 %v1305_v63, %v1355_v45  ;;  %v1307_v58 = vadd.f32 %v1120_v46, %v957_v42  ;;  %v1115_v11 = vpop.permute.xlu1 %1114  ;;  %1748 = vperm.xlu0 %3149, %v1576_v15   ;;  %v974_v35 = vadd.f32 %v924_v19, %v670_v10  ;;  %v4492_v32 = vadd.f32 %v625_v36, %v371_v3  ;;  %v5342_v63 = vld [vmem:[#allocation70_spill] sm:$0xff]  ;;  %v5343_v3 = vld [vmem:[#allocation88_spill] sm:$0xff]  ;;  %v5344_v15 = vld [vmem:[#allocation107_spill] sm:$0xff] }
 0x1c9   :  { %v1404_v20 = vmax.f32 %v1304_v44, %v1354_v24  ;;  %v1306_v22 = vadd.f32 %v1115_v11, %v956_v27  ;;  %1673 = vperm.xlu1 %3150, %v1561_v34   ;;  %2201 = vmatpush1.bf16.msra.mxu1 %v1523_v8  ;;  %v908_v7 = vmul.f32 %v4243_v21, %v5341_v38  ;;  %v5345_v46 = vld [vmem:[#allocation36_spill] sm:$0xff]  ;;  %v5346_v8 = vld [vmem:[#allocation54_spill] sm:$0xff]  ;;  %v5347_v1 = vld [vmem:[#allocation69_spill] sm:$0xff] }
 0x1ca   :  { %v1357_v33 = vmul.f32 0.01, %v1307_v58  ;;  %2202 = vmatprep.subr.bf16.mxu1 %v5217_v37  ;;  %v622_v16 = vmul.f32 %v4191_v14, %v5342_v63  ;;  %v352_v44 = vmul.f32 %v4200_v56, %v5343_v3  ;;  %v927_v0 = vmul.f32 %v4243_v21, %v5344_v15  ;;  %v2638_v11 = vld [vmem:[%s5182_s5 + $0x10] sm:$0xff] }
 0x1cb   :  { %v1356_v9 = vmul.f32 0.01, %v1306_v22  ;;  %v1210_v40 = vpop.permute.xlu0 %1209  ;;  %v1524_v39 = vpack.c.bf16 %v1405_v25, %v1404_v20  ;;  %v959_v49 = vadd.f32 %v909_v6, %v4323_v43  ;;  %v958_v10 = vadd.f32 %v908_v7, %v654_v53  ;;  %v5348_v20 = vld [vmem:[#allocation91_spill] sm:$0xff]  ;;  %v5349_v6 = vld [vmem:[#allocation106_spill] sm:$0xff] }
 0x1cc   :  { %v1407_v23 = vmax.f32 %v1307_v58, %v1357_v33  ;;  %v1325_v31 = vadd.f32 %v1210_v40, %v975_v26  ;;  %v1205_v18 = vpop.permute.xlu1 %1204  ;;  %1758 = vperm.xlu0 %3149, %v1578_v60   ;;  %v672_v45 = vadd.f32 %v622_v16, %v368_v59  ;;  %v373_v27 = vmul.f32 %v4200_v56, %v5345_v46  ;;  %v2640_v16 = vld [vmem:[%s5182_s5 + $0x20] sm:$0xff] }
 0x1cd   :  { %v1406_v4 = vmax.f32 %v1306_v22, %v1356_v9  ;;  %v1324_v2 = vadd.f32 %v1205_v18, %v974_v35  ;;  %1683 = vperm.xlu1 %3150, %v1563_v5   ;;  %2203 = vmatpush1.bf16.msra.mxu1 %v1524_v39  ;;  %v606_v29 = vmul.f32 %v4191_v14, %v5346_v8  ;;  %v5350_v9 = vld [vmem:[#allocation37_spill] sm:$0xff] }
 0x1ce   :  { %v1375_v12 = vmul.f32 0.01, %v1325_v31  ;;  %2204 = vmatprep.subr.bf16.mxu1 %v5217_v37  ;;  %v926_v25 = vmul.f32 %v4243_v21, %v5347_v1  ;;  %v911_v22 = vmul.f32 %v4243_v21, %v5348_v20  ;;  %v977_v53 = vadd.f32 %v927_v0, %v4438_v48  ;;  %v5351_v35 = vld [vmem:[#allocation53_spill] sm:$0xff]  ;;  %v1569_v0 = vld [vmem:[%s5181_s4 + $0xd0] sm:$0xff] }
 0x1cf   :  { %v1374_v42 = vmul.f32 0.01, %v1324_v2  ;;  %v1130_v34 = vpop.permute.xlu0 %1129  ;;  %v1525_v24 = vpack.c.bf16 %v1407_v23, %v1406_v4  ;;  %v656_v19 = vadd.f32 %v606_v29, %v352_v44  ;;  %v370_v33 = vmul.f32 %v4200_v56, %v5349_v6  ;;  %v5352_v23 = vld [vmem:[#allocation72_spill] sm:$0xff]  ;;  %v5353_v4 = vld [vmem:[#allocation90_spill] sm:$0xff] }
 0x1d0   :  { %v1309_v36 = vadd.f32 %v1130_v34, %v959_v49  ;;  %v1125_v47 = vpop.permute.xlu1 %1124  ;;  %2676 = vperm.xlu0 %3149, %v2636_v61   ;;  %v1425_v43 = vmax.f32 %v1325_v31, %v1375_v12  ;;  %v976_v62 = vadd.f32 %v926_v25, %v672_v45  ;;  %v627_v40 = vmul.f32 %v4191_v14, %v5350_v9  ;;  %v5354_v61 = vld [vmem:[#allocation109_spill] sm:$0xff]  ;;  %v2642_v1 = vld [vmem:[%s5182_s5 + $0x30] sm:$0xff] }
 0x1d1   :  { %v1308_v58 = vadd.f32 %v1125_v47, %v958_v10  ;;  %1693 = vperm.xlu1 %3150, %v1565_v54   ;;  %2205 = vmatpush1.bf16.msra.mxu1 %v1525_v24  ;;  %v1424_v17 = vmax.f32 %v1324_v2, %v1374_v42  ;;  %v910_v39 = vmul.f32 %v4243_v21, %v5351_v35  ;;  %v5355_v10 = vld [vmem:[#allocation56_spill] sm:$0xff] }
 0x1d2   :  { %v1359_v60 = vmul.f32 0.01, %v1309_v36  ;;  %2206 = vmatprep.subr.bf16.mxu1 %v5217_v37  ;;  %v624_v31 = vmul.f32 %v4191_v14, %v5352_v23  ;;  %v354_v2 = vmul.f32 %v4200_v56, %v5353_v4  ;;  %v929_v3 = vmul.f32 %v4243_v21, %v5354_v61  ;;  %v5358_v20 = vld [vmem:[#allocation108_spill] sm:$0xff] }
 0x1d3   :  { %v1358_v26 = vmul.f32 0.01, %v1308_v58  ;;  %v1220_v5 = vpop.permute.xlu0 %1219  ;;  %v1534_v59 = vpack.c.bf16 %v1425_v43, %v1424_v17  ;;  %v961_v15 = vadd.f32 %v911_v22, %v4330_v51  ;;  %v960_v45 = vadd.f32 %v910_v39, %v656_v19  ;;  %v5356_v51 = vld [vmem:[#allocation71_spill] sm:$0xff]  ;;  %v1571_v19 = vld [vmem:[%s5181_s4 + $0xe0] sm:$0xff] }
 0x1d4   :  { %v1409_v48 = vmax.f32 %v1309_v36, %v1359_v60  ;;  %v1327_v38 = vadd.f32 %v1220_v5, %v977_v53  ;;  %v1215_v7 = vpop.permute.xlu1 %1214  ;;  %2686 = vperm.xlu0 %3149, %v2638_v11   ;;  %v674_v12 = vadd.f32 %v624_v31, %v370_v33  ;;  %v677_v34 = vadd.f32 %v627_v40, %v373_v27  ;;  %v5357_v27 = vld [vmem:[#allocation93_spill] sm:$0xff]  ;;  %v5359_v33 = vld [vmem:[#allocation38_spill] sm:$0xff]  ;;  %v5360_v5 = vld [vmem:[#allocation55_spill] sm:$0xff] }
 0x1d5   :  { %v1408_v18 = vmax.f32 %v1308_v58, %v1358_v26  ;;  %v1326_v63 = vadd.f32 %v1215_v7, %v976_v62  ;;  %1703 = vperm.xlu1 %3150, %v1567_v28   ;;  %2376 = vmatpush1.bf16.msra.mxu0 %v1534_v59  ;;  %v608_v24 = vmul.f32 %v4191_v14, %v5355_v10  ;;  %v5361_v40 = vld [vmem:[#allocation74_spill] sm:$0xff]  ;;  %v5362_v7 = vld [vmem:[#allocation92_spill] sm:$0xff]  ;;  %v5363_v31 = vld [vmem:[#allocation111_spill] sm:$0xff] }
 0x1d6   :  { %v1377_v44 = vmul.f32 0.01, %v1327_v38  ;;  %2377 = vmatprep.subr.bf16.mxu0 %v5217_v37  ;;  %v928_v36 = vmul.f32 %v4243_v21, %v5356_v51  ;;  %v913_v58 = vmul.f32 %v4243_v21, %v5357_v27  ;;  %v979_v17 = vadd.f32 %v929_v3, %v4492_v32  ;;  %v1573_v4 = vld [vmem:[%s5181_s4 + $0xf0] sm:$0xff]  ;;  %v5366_v10 = vld [vmem:[#allocation73_spill] sm:$0xff]  ;;  %v5368_v27 = vld [vmem:[#allocation110_spill] sm:$0xff] }
 0x1d7   :  { %v1376_v49 = vmul.f32 0.01, %v1326_v63  ;;  %v1140_v54 = vpop.permute.xlu0 %1139  ;;  %v1526_v42 = vpack.c.bf16 %v1409_v48, %v1408_v18  ;;  %v658_v25 = vadd.f32 %v608_v24, %v354_v2  ;;  %v372_v22 = vmul.f32 %v4200_v56, %v5358_v20 }
 0x1d8   :  { %v1427_v46 = vmax.f32 %v1327_v38, %v1377_v44  ;;  %v1311_v8 = vadd.f32 %v1140_v54, %v961_v15  ;;  %v1135_v29 = vpop.permute.xlu1 %1134  ;;  %2696 = vperm.xlu0 %3149, %v2640_v16   ;;  %v978_v28 = vadd.f32 %v928_v36, %v674_v12  ;;  %v375_v26 = vmul.f32 %v4200_v56, %v5359_v33  ;;  %v2644_v38 = vld [vmem:[%s5182_s5 + $0x40] sm:$0xff]  ;;  %v5367_v36 = vld [vmem:[#allocation95_spill] sm:$0xff]  ;;  %v5370_v33 = vld [vmem:[#allocation76_spill] sm:$0xff] }
 0x1d9   :  { %v1426_v47 = vmax.f32 %v1326_v63, %v1376_v49  ;;  %v1310_v43 = vadd.f32 %v1135_v29, %v960_v45  ;;  %1713 = vperm.xlu1 %3150, %v1569_v0   ;;  %2207 = vmatpush1.bf16.msra.mxu1 %v1526_v42  ;;  %v912_v62 = vmul.f32 %v4243_v21, %v5360_v5  ;;  %v5364_v0 = vld [vmem:[#allocation39_spill] sm:$0xff]  ;;  %v5365_v49 = vld [vmem:[#allocation58_spill] sm:$0xff] }
 0x1da   :  { %v1361_v11 = vmul.f32 0.01, %v1311_v8  ;;  %2208 = vmatprep.subr.bf16.mxu1 %v5217_v37  ;;  %v626_v35 = vmul.f32 %v4191_v14, %v5361_v40  ;;  %v356_v23 = vmul.f32 %v4200_v56, %v5362_v7  ;;  %v931_v18 = vmul.f32 %v4243_v21, %v5363_v31  ;;  %v2646_v29 = vld [vmem:[%s5182_s5 + $0x50] sm:$0xff]  ;;  %v5372_v40 = vld [vmem:[#allocation113_spill] sm:$0xff] }
 0x1db   :  { %v1360_v60 = vmul.f32 0.01, %v1310_v43  ;;  %v1230_v53 = vpop.permute.xlu0 %1229  ;;  %v1535_v6 = vpack.c.bf16 %v1427_v46, %v1426_v47  ;;  %v963_v16 = vadd.f32 %v913_v58, %v4337_v13  ;;  %v962_v44 = vadd.f32 %v912_v62, %v658_v25  ;;  %v1575_v25 = vld [vmem:[%s5181_s4 + $0x100] sm:$0xff] }
 0x1dc   :  { %v1411_v32 = vmax.f32 %v1311_v8, %v1361_v11  ;;  %v1329_v59 = vadd.f32 %v1230_v53, %v979_v17  ;;  %v1225_v9 = vpop.permute.xlu1 %1224  ;;  %2706 = vperm.xlu0 %3149, %v2642_v1   ;;  %v676_v2 = vadd.f32 %v626_v35, %v372_v22  ;;  %v629_v12 = vmul.f32 %v4191_v14, %v5364_v0 }
 0x1dd   :  { %v1410_v39 = vmax.f32 %v1310_v43, %v1360_v60  ;;  %v1328_v48 = vadd.f32 %v1225_v9, %v978_v28  ;;  %1723 = vperm.xlu1 %3150, %v1571_v19   ;;  %2378 = vmatpush1.bf16.msra.mxu0 %v1535_v6  ;;  %v610_v54 = vmul.f32 %v4191_v14, %v5365_v49  ;;  %v5369_v60 = vld [vmem:[#allocation57_spill] sm:$0xff]  ;;  %v5371_v9 = vld [vmem:[#allocation94_spill] sm:$0xff] }
 0x1de   :  { %v1379_v63 = vmul.f32 0.01, %v1329_v59  ;;  %2379 = vmatprep.subr.bf16.mxu0 %v5217_v37  ;;  %v930_v24 = vmul.f32 %v4243_v21, %v5366_v10  ;;  %v915_v47 = vmul.f32 %v4243_v21, %v5367_v36  ;;  %v981_v1 = vadd.f32 %v931_v18, %v677_v34 }
 0x1df   :  { %v1378_v61 = vmul.f32 0.01, %v1328_v48  ;;  %v1150_v3 = vpop.permute.xlu0 %1149  ;;  %v1527_v15 = vpack.c.bf16 %v1411_v32, %v1410_v39  ;;  %v660_v51 = vadd.f32 %v610_v54, %v356_v23  ;;  %v374_v58 = vmul.f32 %v4200_v56, %v5368_v27  ;;  %v2650_v54 = vld [vmem:[%s5182_s5 + $0x70] sm:$0xff] }
 0x1e0   :  { %v1429_v45 = vmax.f32 %v1329_v59, %v1379_v63  ;;  %v1313_v42 = vadd.f32 %v1150_v3, %v963_v16  ;;  %v1145_v13 = vpop.permute.xlu1 %1144  ;;  %2716 = vperm.xlu0 %3149, %v2644_v38   ;;  %v980_v19 = vadd.f32 %v930_v24, %v676_v2  ;;  %v679_v22 = vadd.f32 %v629_v12, %v375_v26  ;;  %v2648_v59 = vld [vmem:[%s5182_s5 + $0x60] sm:$0xff]  ;;  %v1577_v38 = vld [vmem:[%s5181_s4 + $0x110] sm:$0xff] }
 0x1e1   :  { %v1428_v46 = vmax.f32 %v1328_v48, %v1378_v61  ;;  %v1312_v8 = vadd.f32 %v1145_v13, %v962_v44  ;;  %1733 = vperm.xlu1 %3150, %v1573_v4   ;;  %2209 = vmatpush1.bf16.msra.mxu1 %v1527_v15  ;;  %v914_v53 = vmul.f32 %v4243_v21, %v5369_v60  ;;  %v5373_v16 = vld [vmem:[#allocation40_spill] sm:$0xff]  ;;  %v5375_v15 = vld [vmem:[#allocation75_spill] sm:$0xff] }
 0x1e2   :  { %v1363_v43 = vmul.f32 0.01, %v1313_v42  ;;  %2210 = vmatprep.subr.bf16.mxu1 %v5217_v37  ;;  %v628_v5 = vmul.f32 %v4191_v14, %v5370_v33  ;;  %v358_v26 = vmul.f32 %v4200_v56, %v5371_v9  ;;  %v933_v35 = vmul.f32 %v4243_v21, %v5372_v40  ;;  %v5374_v2 = vld [vmem:[#allocation60_spill] sm:$0xff]  ;;  %v5379_v27 = vld [vmem:[#allocation59_spill] sm:$0xff] }
 0x1e3   :  { %v1362_v11 = vmul.f32 0.01, %v1312_v8  ;;  %v1240_v17 = vpop.permute.xlu0 %1239  ;;  %v1536_v20 = vpack.c.bf16 %v1429_v45, %v1428_v46  ;;  %v965_v48 = vadd.f32 %v915_v47, %v4339_v30  ;;  %v964_v18 = vadd.f32 %v914_v53, %v660_v51  ;;  %v1579_v46 = vld [vmem:[%s5181_s4 + $0x120] sm:$0xff]  ;;  %v5382_v33 = vld [vmem:[#allocation8_spill] sm:$0xff] }
 0x1e4   :  { %v1413_v28 = vmax.f32 %v1313_v42, %v1363_v43  ;;  %v1331_v6 = vadd.f32 %v1240_v17, %v981_v1  ;;  %v1235_v34 = vpop.permute.xlu1 %1234  ;;  %2726 = vperm.xlu0 %3149, %v2646_v29   ;;  %v678_v7 = vadd.f32 %v628_v5, %v374_v58  ;;  %v377_v4 = vmul.f32 %v4200_v56, %v5373_v16  ;;  %v5376_v42 = vld [vmem:[#allocation97_spill] sm:$0xff] }
 0x1e5   :  { %v1412_v62 = vmax.f32 %v1312_v8, %v1362_v11  ;;  %v1330_v32 = vadd.f32 %v1235_v34, %v980_v19  ;;  %1743 = vperm.xlu1 %3150, %v1575_v25   ;;  %2380 = vmatpush1.bf16.msra.mxu0 %v1536_v20  ;;  %v612_v61 = vmul.f32 %v4191_v14, %v5374_v2  ;;  %v5377_v8 = vld [vmem:[#allocation112_spill] sm:$0xff]  ;;  %v5378_v1 = vld [vmem:[#allocation41_spill] sm:$0xff]  ;;  %v5380_v20 = vld [vmem:[#allocation78_spill] sm:$0xff] }
 0x1e6   :  { %v1381_v39 = vmul.f32 0.01, %v1331_v6  ;;  %2381 = vmatprep.subr.bf16.mxu0 %v5217_v37  ;;  %v932_v0 = vmul.f32 %v4243_v21, %v5375_v15  ;;  %v917_v13 = vmul.f32 %v4243_v21, %v5376_v42  ;;  %v983_v24 = vadd.f32 %v933_v35, %v679_v22  ;;  %v2639_v15 = vld [vmem:[%s5182_s5 + $0x18] sm:$0xff] }
 0x1e7   :  { %v1380_v23 = vmul.f32 0.01, %v1330_v32  ;;  %v1160_v31 = vpop.permute.xlu0 %1159  ;;  %v1528_v63 = vpack.c.bf16 %v1413_v28, %v1412_v62  ;;  %v662_v45 = vadd.f32 %v612_v61, %v358_v26  ;;  %v376_v29 = vmul.f32 %v4200_v56, %v5377_v8  ;;  %v2652_v28 = vld [vmem:[%s5182_s5 + $0x80] sm:$0xff]  ;;  %v2654_v61 = vld [vmem:[%s5182_s5 + $0x90] sm:$0xff] }
 0x1e8   :  { %v1431_v3 = vmax.f32 %v1331_v6, %v1381_v39  ;;  %v1315_v44 = vadd.f32 %v1160_v31, %v965_v48  ;;  %v1155_v30 = vpop.permute.xlu1 %1154  ;;  %2736 = vperm.xlu0 %3149, %v2648_v59   ;;  %v982_v47 = vadd.f32 %v932_v0, %v678_v7  ;;  %v631_v25 = vmul.f32 %v4191_v14, %v5378_v1  ;;  %v5381_v6 = vld [vmem:[#allocation96_spill] sm:$0xff]  ;;  %v2637_v59 = vld [vmem:[%s5182_s5 + $0x8] sm:$0xff] }
 0x1e9   :  { %v1430_v12 = vmax.f32 %v1330_v32, %v1380_v23  ;;  %v1314_v49 = vadd.f32 %v1155_v30, %v964_v18  ;;  %1753 = vperm.xlu1 %3150, %v1577_v38   ;;  %2211 = vmatpush1.bf16.msra.mxu1 %v1528_v63  ;;  %v916_v58 = vmul.f32 %v4243_v21, %v5379_v27  ;;  %v5383_v38 = vld [vmem:[#allocation62_spill] sm:$0xff] }
 0x1ea   :  { %v1365_v10 = vmul.f32 0.01, %v1315_v44  ;;  %2212 = vmatprep.subr.bf16.mxu1 %v5217_v37  ;;  %v630_v22 = vmul.f32 %v4191_v14, %v5380_v20  ;;  %v360_v34 = vmul.f32 %v4200_v56, %v5381_v6  ;;  %v935_v5 = vmul.f32 %v4243_v21, %v5382_v33  ;;  %v2643_v6 = vld [vmem:[%s5182_s5 + $0x38] sm:$0xff] }
 0x1eb   :  { %v1364_v51 = vmul.f32 0.01, %v1314_v49  ;;  %v1250_v36 = vpop.permute.xlu0 %1249  ;;  %v1537_v43 = vpack.c.bf16 %v1431_v3, %v1430_v12  ;;  %v967_v32 = vadd.f32 %v917_v13, %v4341_v57  ;;  %v966_v35 = vadd.f32 %v916_v58, %v662_v45  ;;  %v5384_v57 = vld [vmem:[#allocation77_spill] sm:$0xff]  ;;  %v5385_v3 = vld [vmem:[#allocation99_spill] sm:$0xff] }
 0x1ec   :  { %v1415_v11 = vmax.f32 %v1315_v44, %v1365_v10  ;;  %v1333_v17 = vadd.f32 %v1250_v36, %v983_v24  ;;  %v1245_v19 = vpop.permute.xlu1 %1244  ;;  %2746 = vperm.xlu0 %3149, %v2650_v54   ;;  %v680_v9 = vadd.f32 %v630_v22, %v376_v29  ;;  %v681_v48 = vadd.f32 %v631_v25, %v377_v4  ;;  %v2656_v36 = vld [vmem:[%s5182_s5 + $0xa0] sm:$0xff] }
 0x1ed   :  { %v1414_v60 = vmax.f32 %v1314_v49, %v1364_v51  ;;  %v1332_v53 = vadd.f32 %v1245_v19, %v982_v47  ;;  %1763 = vperm.xlu1 %3150, %v1579_v46   ;;  %2382 = vmatpush1.bf16.msra.mxu0 %v1537_v43  ;;  %v614_v7 = vmul.f32 %v4191_v14, %v5383_v38  ;;  %v5386_v46 = vld [vmem:[#allocation61_spill] sm:$0xff]  ;;  %v5387_v19 = vld [vmem:[#allocation114_spill] sm:$0xff] }
 0x1ee   :  { %v1383_v62 = vmul.f32 0.01, %v1333_v17  ;;  %2383 = vmatprep.subr.bf16.mxu0 %v5217_v37  ;;  %v934_v63 = vmul.f32 %v4243_v21, %v5384_v57  ;;  %v919_v4 = vmul.f32 %v4243_v21, %v5385_v3  ;;  %v985_v30 = vadd.f32 %v935_v5, %v681_v48  ;;  %v5390_v48 = vld [vmem:[#allocation42_spill] sm:$0xff] }
 0x1ef   :  { %v1382_v26 = vmul.f32 0.01, %v1332_v53  ;;  %v1170_v40 = vpop.permute.xlu0 %1169  ;;  %v1529_v39 = vpack.c.bf16 %v1415_v11, %v1414_v60  ;;  %v664_v0 = vadd.f32 %v614_v7, %v360_v34  ;;  %v665_v42 = vadd.f32 %v4369_v52, %v4345_v41  ;;  %v2641_v41 = vld [vmem:[%s5182_s5 + $0x28] sm:$0xff]  ;;  %v5388_v34 = vld [vmem:[#allocation80_spill] sm:$0xff] }
 0x1f0   :  { %v1433_v23 = vmax.f32 %v1333_v17, %v1383_v62  ;;  %v1317_v31 = vadd.f32 %v1170_v40, %v967_v32  ;;  %v1165_v18 = vpop.permute.xlu1 %1164  ;;  %2756 = vperm.xlu0 %3149, %v2652_v28   ;;  %v984_v54 = vadd.f32 %v934_v63, %v680_v9  ;;  %v918_v8 = vmul.f32 %v4243_v21, %v5386_v46  ;;  %v2645_v7 = vld [vmem:[%s5182_s5 + $0x48] sm:$0xff] }
 0x1f1   :  { %v1432_v16 = vmax.f32 %v1332_v53, %v1382_v26  ;;  %v1316_v2 = vadd.f32 %v1165_v18, %v966_v35  ;;  %2681 = vperm.xlu1 %3150, %v2637_v59   ;;  %2213 = vmatpush1.bf16.msra.mxu1 %v1529_v39  ;;  %v969_v43 = vadd.f32 %v919_v4, %v665_v42  ;;  %v2658_v53 = vld [vmem:[%s5182_s5 + $0xb0] sm:$0xff]  ;;  %v5389_v59 = vld [vmem:[#allocation98_spill] sm:$0xff] }
 0x1f2   :  { %v1367_v44 = vmul.f32 0.01, %v1317_v31  ;;  %2214 = vmatprep.subr.bf16.mxu1 %v5217_v37  ;;  %v968_v25 = vadd.f32 %v918_v8, %v664_v0  ;;  %v378_v20 = vmul.f32 %v4200_v56, %v5387_v19  ;;  %v632_v33 = vmul.f32 %v4191_v14, %v5388_v34  ;;  %v2660_v39 = vld [vmem:[%s5182_s5 + $0xc0] sm:$0xff]  ;;  %v5392_v18 = vld [vmem:[#allocation64_spill] sm:$0xff]  ;;  %v5393_v63 = vld [vmem:[#allocation79_spill] sm:$0xff] }
 0x1f3   :  { %v1366_v12 = vmul.f32 0.01, %v1316_v2  ;;  %v1260_v49 = vpop.permute.xlu0 %1259  ;;  %v1538_v45 = vpack.c.bf16 %v1433_v23, %v1432_v16  ;;  %v362_v9 = vmul.f32 %v4200_v56, %v5389_v59  ;;  %v379_v38 = vmul.f32 %v4200_v56, %v5390_v48  ;;  %v5391_v23 = vld [vmem:[#allocation43_spill] sm:$0xff]  ;;  %v5400_v59 = vld [vmem:[#allocation82_spill] sm:$0xff] }
 0x1f4   :  { %v1417_v13 = vmax.f32 %v1317_v31, %v1367_v44  ;;  %v1335_v10 = vadd.f32 %v1260_v49, %v985_v30  ;;  %v1255_v24 = vpop.permute.xlu1 %1254  ;;  %2766 = vperm.xlu0 %3149, %v2654_v61   ;;  %v682_v26 = vadd.f32 %v632_v33, %v378_v20  ;;  %v633_v31 = vmul.f32 %v4191_v14, %v5391_v23  ;;  %v2662_v44 = vld [vmem:[%s5182_s5 + $0xd0] sm:$0xff]  ;;  %v5394_v30 = vld [vmem:[#allocation26_spill] sm:$0xff] }
 0x1f5   :  { %v1416_v29 = vmax.f32 %v1316_v2, %v1366_v12  ;;  %v1334_v51 = vadd.f32 %v1255_v24, %v984_v54  ;;  %2691 = vperm.xlu1 %3150, %v2639_v15   ;;  %2384 = vmatpush1.bf16.msra.mxu0 %v1538_v45  ;;  %v616_v57 = vmul.f32 %v4191_v14, %v5392_v18  ;;  %v2647_v12 = vld [vmem:[%s5182_s5 + $0x58] sm:$0xff]  ;;  %v5395_v49 = vld [vmem:[#allocation27_spill] sm:$0xff]  ;;  %v2668_v33 = vld [vmem:[%s5182_s5 + $0x100] sm:$0xff] }
 0x1f6   :  { %v1385_v47 = vmul.f32 0.01, %v1335_v10  ;;  %2385 = vmatprep.subr.bf16.mxu0 %v5217_v37  ;;  %v936_v16 = vmul.f32 %v4243_v21, %v5393_v63  ;;  %v937_v3 = vmul.f32 %v4243_v21, %v4299_v55  ;;  %v363_v15 = vmul.f32 %v4200_v56, %v5394_v30  ;;  %v5396_v45 = vld [vmem:[#allocation63_spill] sm:$0xff]  ;;  %v5397_v24 = vld [vmem:[#allocation101_spill] sm:$0xff]  ;;  %v5402_v23 = vld [vmem:[#allocation44_spill] sm:$0xff] }
 0x1f7   :  { %v1384_v52 = vmul.f32 0.01, %v1334_v51  ;;  %v1180_v1 = vpop.permute.xlu0 %1179  ;;  %v1530_v27 = vpack.c.bf16 %v1417_v13, %v1416_v29  ;;  %v666_v61 = vadd.f32 %v616_v57, %v362_v9  ;;  %v617_v55 = vmul.f32 %v4191_v14, %v5395_v49  ;;  %v5403_v18 = vld [vmem:[#allocation45_spill] sm:$0xff]  ;;  %v5405_v30 = vld [vmem:[#allocation28_spill] sm:$0xff] }
 0x1f8   :  { %v1435_v58 = vmax.f32 %v1335_v10, %v1385_v47  ;;  %v1319_v11 = vadd.f32 %v1180_v1, %v969_v43  ;;  %v1175_v17 = vpop.permute.xlu1 %1174  ;;  %2776 = vperm.xlu0 %3149, %v2656_v36   ;;  %v986_v4 = vadd.f32 %v936_v16, %v682_v26  ;;  %v683_v54 = vadd.f32 %v633_v31, %v379_v38  ;;  %v2649_v47 = vld [vmem:[%s5182_s5 + $0x68] sm:$0xff]  ;;  %v5407_v49 = vld [vmem:[#allocation65_spill] sm:$0xff] }
 0x1f9   :  { %v1434_v22 = vmax.f32 %v1334_v51, %v1384_v52  ;;  %v1318_v60 = vadd.f32 %v1175_v17, %v968_v25  ;;  %2701 = vperm.xlu1 %3150, %v2641_v41   ;;  %2215 = vmatpush1.bf16.msra.mxu1 %v1530_v27  ;;  %v920_v42 = vmul.f32 %v4243_v21, %v5396_v45  ;;  %v2664_v51 = vld [vmem:[%s5182_s5 + $0xe0] sm:$0xff]  ;;  %v2651_v17 = vld [vmem:[%s5182_s5 + $0x78] sm:$0xff] }
 0x1fa   :  { %v1369_v28 = vmul.f32 0.01, %v1319_v11  ;;  %2216 = vmatprep.subr.bf16.mxu1 %v5217_v37  ;;  %v921_v46 = vmul.f32 %v4243_v21, %v5397_v24  ;;  %v987_v29 = vadd.f32 %v937_v3, %v683_v54  ;;  %v667_v43 = vadd.f32 %v617_v55, %v363_v15  ;;  %v5401_v38 = vld [vmem:[#allocation66_spill] sm:$0xff]  ;;  %v5404_v3 = vld [vmem:[#allocation81_spill] sm:$0xff]  ;;  %v5409_v24 = vld [vmem:[#allocation47_spill] sm:$0xff] }
 0x1fb   :  { %v1368_v5 = vmul.f32 0.01, %v1318_v60  ;;  %v1539_v62 = vpack.c.bf16 %v1435_v58, %v1434_v22  ;;  %v1185_v10 = vpop.permute.xlu0 %1184  ;;  %v970_v8 = vadd.f32 %v920_v42, %v666_v61  ;;  %v2666_v58 = vld [vmem:[%s5182_s5 + $0xf0] sm:$0xff]  ;;  %v634_v9 = vmul.f32 %v4191_v14, %v5400_v59  ;;  %v2655_v61 = vld [vmem:[%s5182_s5 + $0x98] sm:$0xff] }
 0x1fc   :  { %v1419_v32 = vmax.f32 %v1319_v11, %v1369_v28  ;;  %2786 = vperm.xlu0 %3149, %v2658_v53   ;;  %v971_v27 = vadd.f32 %v921_v46, %v667_v43  ;;  %v5398_v53 = vld [vmem:[#allocation9_spill] sm:$0xff]  ;;  %v381_v31 = vmul.f32 %v4200_v56, %v5402_v23  ;;  %v635_v57 = vmul.f32 %v4191_v14, %v5403_v18 }
 0x1fd   :  { %v1418_v40 = vmax.f32 %v1318_v60, %v1368_v5  ;;  %2711 = vperm.xlu1 %3150, %v2643_v6   ;;  %v874_v35 = vpop.permute.xlu1 %873  ;;  %2386 = vmatpush1.bf16.msra.mxu0 %v1539_v62  ;;  %v1320_v41 = vadd.f32 %v1185_v10, %v970_v8  ;;  %v380_v28 = vmul.f32 %v4200_v56, %v5398_v53  ;;  %v5399_v5 = vld [vmem:[#allocation100_spill] sm:$0xff] }
 0x1fe   :  { %2387 = vmatprep.subr.bf16.mxu0 %v5217_v37  ;;  %v364_v62 = vmul.f32 %v4200_v56, %v5399_v5  ;;  %v365_v15 = vmul.f32 %v4200_v56, %v5405_v30  ;;  %v922_v55 = vmul.f32 %v4243_v21, %v5407_v49  ;;  %v685_v42 = vadd.f32 %v635_v57, %v381_v31  ;;  %v2663_v57 = vld [vmem:[%s5182_s5 + $0xd8] sm:$0xff]  ;;  %v1580_v49 = vld [vmem:[%s5181_s4 + $0x128] sm:$0xf] }
 0x1ff   :  { %v1531_v2 = vpack.c.bf16 %v1419_v32, %v1418_v40  ;;  %v1370_v19 = vmul.f32 0.01, %v1320_v41  ;;  %v2653_v32 = vld [vmem:[%s5182_s5 + $0x88] sm:$0xff]  ;;  %v938_v40 = vmul.f32 %v4243_v21, %v874_v35  ;;  %v684_v63 = vadd.f32 %v634_v9, %v380_v28  ;;  %v1195_v54 = vpop.permute.xlu0 %1194 }
 0x200   :  { %2796 = vperm.xlu0 %3149, %v2660_v39   ;;  %v2669_v35 = vld [vmem:[%s5182_s5 + $0x108] sm:$0xff]  ;;  %v637_v46 = vmul.f32 %v4191_v14, %v5409_v24 }
 0x201   :  { %2721 = vperm.xlu1 %3150, %v2645_v7   ;;  %2217 = vmatpush1.bf16.msra.mxu1 %v1531_v2  ;;  %v1420_v26 = vmax.f32 %v1320_v41, %v1370_v19  ;;  %v618_v7 = vmul.f32 %v4191_v14, %v5401_v38  ;;  %v5411_v41 = vld [vmem:[#allocation103_spill] sm:$0xff] }
 0x202   :  { %v1265_v0 = vpop.permute.xlu1 %1264  ;;  %2218 = vmatprep.subr.bf16.mxu1 %v5217_v37  ;;  %v3160_v30 = vld [vmem:[%s5180_s3 + $0x2c] ss:$16 sps:$4 sm:$0xff]   ;;  %v3168_v24 = vld [vmem:[%s5180_s3 + $0x48] ss:$16 sps:$4 sm:$0xff]  }
 0x203   :  { %v1336_v13 = vadd.f32 %v1265_v0, %v986_v4  ;;  %v668_v2 = vadd.f32 %v618_v7, %v364_v62  ;;  %v939_v4 = vmul.f32 %v4243_v21, %v5404_v3  ;;  %v5406_v0 = vld [vmem:[#allocation29_spill] sm:$0xff]  ;;  %v1290_v28 = vpop.permute.xlu0 %1289  ;;  %v2665_v3 = vld [vmem:[%s5182_s5 + $0xe8] sm:$0xff] }
 0x204   :  { %2806 = vperm.xlu0 %3149, %v2662_v44   ;;  %v988_v44 = vadd.f32 %v938_v40, %v684_v63 }
 0x205   :  { %2731 = vperm.xlu1 %3150, %v2647_v12   ;;  %v1386_v52 = vmul.f32 0.01, %v1336_v13  ;;  %v619_v12 = vmul.f32 %v4191_v14, %v5406_v0  ;;  %v3159_v0 = vld [vmem:[%s5180_s3 + $0x20] ss:$16 sps:$4 sm:$0xff]  }
 0x206   :  { %v1270_v36 = vpop.permute.xlu1 %1269 }
 0x207   :  { %v1337_v1 = vadd.f32 %v1270_v36, %v987_v29  ;;  %v1436_v20 = vmax.f32 %v1336_v13, %v1386_v52  ;;  %v5408_v13 = vld [vmem:[#allocation46_spill] sm:$0xff]  ;;  %v2671_v29 = vld [vmem:[%s5182_s5 + $0x118] sm:$0xff]  ;;  %v923_v52 = vmul.f32 %v4243_v21, %v5411_v41 }
 0x208   :  { %2816 = vperm.xlu0 %3149, %v2664_v51   ;;  %v383_v10 = vmul.f32 %v4200_v56, %v5408_v13  ;;  %v972_v51 = vadd.f32 %v922_v55, %v668_v2  ;;  %v2657_v36 = vld [vmem:[%s5182_s5 + $0xa8] sm:$0xff]  ;;  %v3169_v13 = vld [vmem:[%s5180_s3 + $0x64] ss:$16 sps:$4 sm:$0xff]  }
 0x209   :  { %v1387_v25 = vmul.f32 0.01, %v1337_v1  ;;  %2741 = vperm.xlu1 %3150, %v2649_v47   ;;  %v5410_v47 = vld [vmem:[#allocation83_spill] sm:$0xff] }
 0x20a   :  { %v1190_v11 = vpop.permute.xlu1 %1189  ;;  %v941_v43 = vmul.f32 %v4243_v21, %v5410_v47  ;;  %v3162_v55 = vld [vmem:[%s5180_s3 + $0x28] ss:$16 sps:$4 sm:$0xff]   ;;  %v3177_v47 = vld [vmem:[%s5180_s3 + $0x80] ss:$16 sps:$4 sm:$0xff]  }
 0x20b   :  { %v1437_v22 = vmax.f32 %v1337_v1, %v1387_v25  ;;  %v1321_v60 = vadd.f32 %v1190_v11, %v971_v27  ;;  %v989_v1 = vadd.f32 %v939_v4, %v685_v42  ;;  %v382_v25 = vmul.f32 %v4200_v56, %v4301_v50  ;;  %v2659_v56 = vld [vmem:[%s5182_s5 + $0xb8] sm:$0xff]  ;;  %v3157_v4 = vld [vmem:[%s5180_s3 + $0x24] ss:$16 sps:$4 sm:$0xff]   ;;  %v3165_v42 = vld [vmem:[%s5180_s3 + $0x40] ss:$16 sps:$4 sm:$0xff]  }
 0x20c   :  { %2826 = vperm.xlu0 %3149, %v2666_v58   ;;  %v1322_v27 = vadd.f32 %v1195_v54, %v972_v51  ;;  %v669_v11 = vadd.f32 %v619_v12, %v365_v15  ;;  %v2667_v15 = vld [vmem:[%s5182_s5 + $0xf8] sm:$0xff]  ;;  %v3163_v12 = vld [vmem:[%s5180_s3 + $0x44] ss:$16 sps:$4 sm:$0xff]  }
 0x20d   :  { %v1371_v6 = vmul.f32 0.01, %v1321_v60  ;;  %2751 = vperm.xlu1 %3150, %v2651_v17   ;;  %v1540_v34 = vpack.c.bf16 %v1437_v22, %v1436_v20  ;;  %v687_v17 = vadd.f32 %v637_v46, %v383_v10  ;;  %v2673_v22 = vld [vmem:[%s5182_s5 + $0x128] sm:$0xf]  ;;  %v3166_v54 = vld [vmem:[%s5180_s3 + $0x4c] ss:$16 sps:$4 sm:$0xff]  }
 0x20e   :  { %v1372_v62 = vmul.f32 0.01, %v1322_v27  ;;  %v2672_v10 = vld [vmem:[%s5182_s5 + $0x120] sm:$0xff]  ;;  %v3172_v46 = vld [vmem:[%s5180_s3 + $0x6c] ss:$16 sps:$4 sm:$0xff]  }
 0x20f   :  { %v1421_v39 = vmax.f32 %v1321_v60, %v1371_v6  ;;  %v882_v48 = vpop.permute.xlu1 %881  ;;  %2388 = vmatpush1.bf16.msra.mxu0 %v1540_v34  ;;  %v5412_v60 = vld [vmem:[#allocation84_spill] sm:$0xff]  ;;  %v991_v50 = vadd.f32 %v941_v43, %v687_v17 }
 0x210   :  { %2836 = vperm.xlu0 %3149, %v2668_v33   ;;  %2389 = vmatprep.subr.bf16.mxu0 %v5217_v37  ;;  %v636_v53 = vmul.f32 %v4191_v14, %v5412_v60  ;;  %v940_v6 = vmul.f32 %v4243_v21, %v882_v48  ;;  %v973_v33 = vadd.f32 %v923_v52, %v669_v11  ;;  %v2661_v14 = vld [vmem:[%s5182_s5 + $0xc8] sm:$0xff]  ;;  %v3181_v43 = vld [vmem:[%s5180_s3 + $0xa4] ss:$16 sps:$4 sm:$0xff]   ;;  %v3189_v11 = vld [vmem:[%s5180_s3 + $0xc0] ss:$16 sps:$4 sm:$0xff]  }
 0x211   :  { %2761 = vperm.xlu1 %3150, %v2653_v32   ;;  %v1532_v16 = vpack.c.bf16 %v1421_v39, %v1420_v26  ;;  %v1341_v59 = vadd.f32 %v1290_v28, %v991_v50  ;;  %v1422_v21 = vmax.f32 %v1322_v27, %v1372_v62  ;;  %v3174_v51 = vld [vmem:[%s5180_s3 + $0x68] ss:$16 sps:$4 sm:$0xff]   ;;  %v3184_v52 = vld [vmem:[%s5180_s3 + $0xac] ss:$16 sps:$4 sm:$0xff]   ;;  %v3193_v17 = vld [vmem:[%s5180_s3 + $0xe4] ss:$16 sps:$4 sm:$0xff]  }
 0x212   :  { %v686_v5 = vadd.f32 %v636_v53, %v382_v25  ;;  %v3180_v41 = vld [vmem:[%s5180_s3 + $0x88] ss:$16 sps:$4 sm:$0xff]   ;;  %v3187_v25 = vld [vmem:[%s5180_s3 + $0xc4] ss:$16 sps:$4 sm:$0xff]   ;;  %v3202_v28 = vld [vmem:[%s5180_s3 + $0x10c] ss:$16 sps:$4 sm:$0xff]  }
 0x213   :  { %2219 = vmatpush1.bf16.msra.mxu1 %v1532_v16  ;;  %v1391_v48 = vmul.f32 0.01, %v1341_v59  ;;  %v3186_v27 = vld [vmem:[%s5180_s3 + $0xa8] ss:$16 sps:$4 sm:$0xff]   ;;  %v3199_v60 = vld [vmem:[%s5180_s3 + $0x104] ss:$16 sps:$4 sm:$0xff]  }
 0x214   :  { %v1275_v45 = vpop.permute.xlu1 %1274  ;;  %2841 = vperm.xlu0 %3149, %v2669_v35   ;;  %2220 = vmatprep.subr.bf16.mxu1 %v5217_v37  ;;  %v990_v38 = vadd.f32 %v940_v6, %v686_v5  ;;  %v3151_v35 = vld [vmem:[%s5180_s3] ss:$16 sps:$4 sm:$0xff]   ;;  %v3198_v53 = vld [vmem:[%s5180_s3 + $0xe8] ss:$16 sps:$4 sm:$0xff]   ;;  %v3205_v50 = vld [vmem:[%s5180_s3 + $0x124] ss:$16 sps:$4 sm:$0xff]  }
 0x215   :  { %v1338_v8 = vadd.f32 %v1275_v45, %v988_v44  ;;  %2771 = vperm.xlu1 %3150, %v2655_v61   ;;  %v1441_v2 = vmax.f32 %v1341_v59, %v1391_v48  ;;  %v2670_v45 = vld [vmem:[%s5182_s5 + $0x110] sm:$0xff]  ;;  %v3204_v6 = vld [vmem:[%s5180_s3 + $0x108] ss:$16 sps:$4 sm:$0xff]  }
 0x216   :  { %v3211_v5 = vld [vmem:[%s5180_s3 + $0x144] ss:$16 sps:$4 sm:$0xff]   ;;  %v3210_v62 = vld [vmem:[%s5180_s3 + $0x128] ss:$16 sps:$4 sm:$0xff]   ;;  %v3213_v59 = vld [vmem:[%s5180_s3 + $0x140] ss:$16 sps:$4 sm:$0xff]  }
 0x217   :  { %v1388_v19 = vmul.f32 0.01, %v1338_v8  ;;  %v3228_v48 = vld [vmem:[%s5180_s3 + $0x188] ss:$16 sps:$4 sm:$0xff]  }
 0x218   :  { %v1280_v58 = vpop.permute.xlu1 %1279  ;;  %2851 = vperm.xlu0 %3149, %v2671_v29   ;;  %v3175_v29 = vld [vmem:[%s5180_s3 + $0x84] ss:$16 sps:$4 sm:$0xff]  }
 0x219   :  { %v1339_v20 = vadd.f32 %v1280_v58, %v989_v1  ;;  %2781 = vperm.xlu1 %3150, %v2657_v36   ;;  %v1438_v9 = vmax.f32 %v1338_v8, %v1388_v19  ;;  %v3171_v8 = vld [vmem:[%s5180_s3 + $0x60] ss:$16 sps:$4 sm:$0xff]   ;;  %v3178_v36 = vld [vmem:[%s5180_s3 + $0x8c] ss:$16 sps:$4 sm:$0xff]   ;;  %v3192_v19 = vld [vmem:[%s5180_s3 + $0xc8] ss:$16 sps:$4 sm:$0xff]  }
 0x21a   :  { %v3183_v1 = vld [vmem:[%s5180_s3 + $0xa0] ss:$16 sps:$4 sm:$0xff]   ;;  %v3190_v58 = vld [vmem:[%s5180_s3 + $0xcc] ss:$16 sps:$4 sm:$0xff]  }
 0x21b   :  { %v1389_v34 = vmul.f32 0.01, %v1339_v20 }
 0x21c   :  { %v1200_v32 = vpop.permute.xlu1 %1199  ;;  %2861 = vperm.xlu0 %3149, %v2673_v22   ;;  %v3195_v22 = vld [vmem:[%s5180_s3 + $0xe0] ss:$16 sps:$4 sm:$0xff]  }
 0x21d   :  { %v1439_v26 = vmax.f32 %v1339_v20, %v1389_v34  ;;  %v1323_v40 = vadd.f32 %v1200_v32, %v973_v33  ;;  %2791 = vperm.xlu1 %3150, %v2659_v56   ;;  %v3196_v20 = vld [vmem:[%s5180_s3 + $0xec] ss:$16 sps:$4 sm:$0xff]   ;;  %v3201_v56 = vld [vmem:[%s5180_s3 + $0x100] ss:$16 sps:$4 sm:$0xff]  }
 0x21e   :  { %v3208_v34 = vld [vmem:[%s5180_s3 + $0x12c] ss:$16 sps:$4 sm:$0xff]   ;;  %v3207_v33 = vld [vmem:[%s5180_s3 + $0x120] ss:$16 sps:$4 sm:$0xff]  }
 0x21f   :  { %v1373_v39 = vmul.f32 0.01, %v1323_v40  ;;  %v1541_v7 = vpack.c.bf16 %v1439_v26, %v1438_v9  ;;  %v3214_v32 = vld [vmem:[%s5180_s3 + $0x14c] ss:$16 sps:$4 sm:$0xff]   ;;  %v3217_v9 = vld [vmem:[%s5180_s3 + $0x164] ss:$16 sps:$4 sm:$0xff]  }
 0x220   :  { %v1285_v23 = vpop.permute.xlu1 %1284  ;;  %v3216_v26 = vld [vmem:[%s5180_s3 + $0x148] ss:$16 sps:$4 sm:$0xff]  }
 0x221   :  { %v1423_v31 = vmax.f32 %v1323_v40, %v1373_v39  ;;  %v1340_v18 = vadd.f32 %v1285_v23, %v990_v38  ;;  %2801 = vperm.xlu1 %3150, %v2661_v14   ;;  %2390 = vmatpush1.bf16.msra.mxu0 %v1541_v7  ;;  %v3220_v40 = vld [vmem:[%s5180_s3 + $0x16c] ss:$16 sps:$4 sm:$0xff]   ;;  %v3219_v14 = vld [vmem:[%s5180_s3 + $0x160] ss:$16 sps:$4 sm:$0xff]   ;;  %v3223_v39 = vld [vmem:[%s5180_s3 + $0x184] ss:$16 sps:$4 sm:$0xff]  }
 0x222   :  { %2391 = vmatprep.subr.bf16.mxu0 %v5217_v37  ;;  %v3154_v37 = vld [vmem:[%s5180_s3 + $0x8] ss:$16 sps:$4 sm:$0xff]   ;;  %v3226_v7 = vld [vmem:[%s5180_s3 + $0x18c] ss:$16 sps:$4 sm:$0xff]   ;;  %v3225_v23 = vld [vmem:[%s5180_s3 + $0x180] ss:$16 sps:$4 sm:$0xff]  }
 0x223   :  { %v1390_v63 = vmul.f32 0.01, %v1340_v18  ;;  %v1533_v16 = vpack.c.bf16 %v1423_v31, %v1422_v21  ;;  %v3222_v38 = vld [vmem:[%s5180_s3 + $0x168] ss:$16 sps:$4 sm:$0xff]   ;;  %v3229_v21 = vld [vmem:[%s5180_s3 + $0x1a4] ss:$16 sps:$4 sm:$0xff]  }
 0x224   :  { %v3232_v31 = vld [vmem:[%s5180_s3 + $0x1ac] ss:$16 sps:$4 sm:$0xff]  }
 0x225   :  { %v1440_v61 = vmax.f32 %v1340_v18, %v1390_v63  ;;  %2811 = vperm.xlu1 %3150, %v2663_v57   ;;  %2221 = vmatpush1.bf16.msra.mxu1 %v1533_v16  ;;  %v3231_v18 = vld [vmem:[%s5180_s3 + $0x1a0] ss:$16 sps:$4 sm:$0xff]   ;;  %v3235_v57 = vld [vmem:[%s5180_s3 + $0x1c4] ss:$16 sps:$4 sm:$0xff]   ;;  %v3234_v63 = vld [vmem:[%s5180_s3 + $0x1a8] ss:$16 sps:$4 sm:$0xff]  }
 0x226   :  { %v3238_v16 = vld [vmem:[%s5180_s3 + $0x1cc] ss:$16 sps:$4 sm:$0xff]  }
 0x227   :  { %v1542_v44 = vpack.c.bf16 %v1441_v2, %v1440_v61  ;;  %v4995_v2 = vpop.permute.xlu1 %1583  ;;  %v3241_v61 = vld [vmem:[%s5180_s3 + $0x1e4] ss:$16 sps:$4 sm:$0xff]  }
 0x228   :  { %2223 = vmatmul.mubr.bf16.vlgmr.msra.gmra.mrb[0].mxu1 %v3151_v35  ;;  %v3237_v35 = vld [vmem:[%s5180_s3 + $0x1c0] ss:$16 sps:$4 sm:$0xff]  }
 0x229   :  { %2821 = vperm.xlu1 %3150, %v2665_v3   ;;  %2392 = vmatpush1.bf16.msra.mxu0 %v1542_v44  ;;  %v3240_v3 = vld [vmem:[%s5180_s3 + $0x1c8] ss:$16 sps:$4 sm:$0xff]   ;;  %v5007_v44 = vpop.permute.xlu0 %1588 }
 0x22a   :  { %2230 = vmatprep.mubr.bf16.mxu1 %v3157_v4  ;;  %v3244_v4 = vld [vmem:[%s5180_s3 + $0x1ec] ss:$16 sps:$4 sm:$0xff]  }
 0x22c   :  { %2408 = vmatmul.mubr.bf16.vlgmr.msra.gmra.mrb[0].mxu0 %v3154_v37  ;;  %v5009_v37 = vpop.permute.xlu1 %1593 }
 0x22d   :  { %2831 = vperm.xlu1 %3150, %v2667_v15   ;;  %3042 = vmatprep.mubr.msk.bf16.mxu0 %vm2132_vm0, %v3160_v30  ;;  %v3243_v30 = vld [vmem:[%s5180_s3 + $0x1e0] ss:$16 sps:$4 sm:$0xff]   ;;  %v3247_v15 = vld [vmem:[%s5180_s3 + $0x204] ss:$16 sps:$4 sm:$0xff]  }
 0x230   :  { %2231 = vmatmul.mubr.bf16.gmra.mrb[4].mxu1 %v3159_v0  ;;  %v5018_v0 = vpop.permute.xlu0 %1598 }
 0x231   :  { %1768 = vperm.xlu1 %3150, %v1580_v49   ;;  %2238 = vmatprep.mubr.bf16.mxu1 %v3163_v12  ;;  %v3246_v12 = vld [vmem:[%s5180_s3 + $0x1e8] ss:$16 sps:$4 sm:$0xff]   ;;  %v5023_v49 = vpop.permute.xlu1 %1603 }
 0x234   :  { %2416 = vmatmul.mubr.bf16.gmra.mrb[4].mxu0 %v3162_v55  ;;  %v3250_v55 = vld [vmem:[%s5180_s3 + $0x20c] ss:$16 sps:$4 sm:$0xff]  }
 0x235   :  { %2846 = vperm.xlu1 %3150, %v2670_v45   ;;  %3043 = vmatprep.mubr.msk.bf16.mxu0 %vm2132_vm0, %v3166_v54  ;;  %v3249_v54 = vld [vmem:[%s5180_s3 + $0x200] ss:$16 sps:$4 sm:$0xff]   ;;  %v3253_v45 = vld [vmem:[%s5180_s3 + $0x224] ss:$16 sps:$4 sm:$0xff]  }
 0x238   :  { %2239 = vmatmul.mubr.bf16.gmra.mrb[8].mxu1 %v3165_v42  ;;  %v5035_v42 = vpop.permute.xlu0 %1608 }
 0x239   :  { %2856 = vperm.xlu1 %3150, %v2672_v10   ;;  %2246 = vmatprep.mubr.bf16.mxu1 %v3169_v13  ;;  %v5037_v13 = vpop.permute.xlu1 %1613  ;;  %v3252_v10 = vld [vmem:[%s5180_s3 + $0x208] ss:$16 sps:$4 sm:$0xff]  }
 0x23c   :  { %2424 = vmatmul.mubr.bf16.gmra.mrb[8].mxu0 %v3168_v24  ;;  %v3256_v24 = vld [vmem:[%s5180_s3 + $0x22c] ss:$16 sps:$4 sm:$0xff]  }
 0x23d   :  { %3044 = vmatprep.mubr.msk.bf16.mxu0 %vm2132_vm0, %v3172_v46  ;;  %v5045_v46 = vpop.permute.xlu0 %1618 }
 0x240   :  { %2247 = vmatmul.mubr.bf16.gmra.mrb[12].mxu1 %v3171_v8  ;;  %v3255_v8 = vld [vmem:[%s5180_s3 + $0x220] ss:$16 sps:$4 sm:$0xff]  }
 0x241   :  { %2254 = vmatprep.mubr.bf16.mxu1 %v3175_v29  ;;  %v5050_v29 = vpop.permute.xlu1 %1623 }
 0x244   :  { %2432 = vmatmul.mubr.bf16.gmra.mrb[12].mxu0 %v3174_v51  ;;  %v3259_v51 = vld [vmem:[%s5180_s3 + $0x244] ss:$16 sps:$4 sm:$0x3f]  }
 0x245   :  { %3045 = vmatprep.mubr.msk.bf16.mxu0 %vm2132_vm0, %v3178_v36  ;;  %v3258_v36 = vld [vmem:[%s5180_s3 + $0x228] ss:$16 sps:$4 sm:$0xff]  }
 0x248   :  { %2255 = vmatmul.mubr.bf16.gmra.mrb[16].mxu1 %v3177_v47  ;;  %v3262_v47 = vld [vmem:[%s5180_s3 + $0x24c] ss:$16 sps:$4 sm:$0x3f]  }
 0x249   :  { %2262 = vmatprep.mubr.bf16.mxu1 %v3181_v43  ;;  %v5062_v43 = vpop.permute.xlu0 %1628 }
 0x24c   :  { %2440 = vmatmul.mubr.bf16.gmra.mrb[16].mxu0 %v3180_v41  ;;  %v5064_v41 = vpop.permute.xlu1 %1633 }
 0x24d   :  { %3046 = vmatprep.mubr.msk.bf16.mxu0 %vm2132_vm0, %v3184_v52  ;;  %v3261_v52 = vld [vmem:[%s5180_s3 + $0x240] ss:$16 sps:$4 sm:$0x3f]  }
 0x250   :  { %2263 = vmatmul.mubr.bf16.gmra.mrb[20].mxu1 %v3183_v1  ;;  %v5070_v1 = vpop.permute.xlu0 %1638 }
 0x251   :  { %2270 = vmatprep.mubr.bf16.mxu1 %v3187_v25  ;;  %v3264_v25 = vld [vmem:[%s5180_s3 + $0x248] ss:$16 sps:$4 sm:$0x3f]  }
 0x254   :  { %2448 = vmatmul.mubr.bf16.gmra.mrb[20].mxu0 %v3186_v27  ;;  %v5075_v27 = vpop.permute.xlu1 %1643 }
 0x255   :  { %3047 = vmatprep.mubr.msk.bf16.mxu0 %vm2132_vm0, %v3190_v58  ;;  %v5077_v58 = vpop.permute.xlu0 %1648 }
 0x258   :  { %2271 = vmatmul.mubr.bf16.gmra.mrb[24].mxu1 %v3189_v11  ;;  %v5079_v11 = vpop.permute.xlu1 %1653 }
 0x259   :  { %2278 = vmatprep.mubr.bf16.mxu1 %v3193_v17  ;;  %v5081_v17 = vpop.permute.xlu0 %1658 }
 0x25c   :  { %2456 = vmatmul.mubr.bf16.gmra.mrb[24].mxu0 %v3192_v19  ;;  %v5083_v19 = vpop.permute.xlu1 %1663 }
 0x25d   :  { %3048 = vmatprep.mubr.msk.bf16.mxu0 %vm2132_vm0, %v3196_v20  ;;  %v5085_v20 = vpop.permute.xlu0 %1668 }
 0x260   :  { %2279 = vmatmul.mubr.bf16.gmra.mrb[28].mxu1 %v3195_v22  ;;  %v5087_v22 = vpop.permute.xlu1 %1673 }
 0x261   :  { %2286 = vmatprep.mubr.bf16.mxu1 %v3199_v60  ;;  %v5089_v60 = vpop.permute.xlu0 %1678 }
 0x264   :  { %2464 = vmatmul.mubr.bf16.gmra.mrb[28].mxu0 %v3198_v53  ;;  %v5091_v53 = vpop.permute.xlu1 %1683 }
 0x265   :  { %3049 = vmatprep.mubr.msk.bf16.mxu0 %vm2132_vm0, %v3202_v28  ;;  %v5093_v28 = vpop.permute.xlu0 %1688 }
 0x268   :  { %2287 = vmatmul.mubr.bf16.gmra.mrb[32].mxu1 %v3201_v56  ;;  %v5095_v56 = vpop.permute.xlu1 %1693 }
 0x269   :  { %2294 = vmatprep.mubr.bf16.mxu1 %v3205_v50  ;;  %v5097_v50 = vpop.permute.xlu0 %1698 }
 0x26c   :  { %2472 = vmatmul.mubr.bf16.gmra.mrb[32].mxu0 %v3204_v6  ;;  %v5099_v6 = vpop.permute.xlu1 %1703 }
 0x26d   :  { %3050 = vmatprep.mubr.msk.bf16.mxu0 %vm2132_vm0, %v3208_v34  ;;  %v5101_v34 = vpop.permute.xlu0 %1708 }
 0x270   :  { %2295 = vmatmul.mubr.bf16.gmra.mrb[36].mxu1 %v3207_v33  ;;  %v5103_v33 = vpop.permute.xlu1 %1713 }
 0x271   :  { %2302 = vmatprep.mubr.bf16.mxu1 %v3211_v5  ;;  %v5105_v5 = vpop.permute.xlu0 %1718 }
 0x274   :  { %2480 = vmatmul.mubr.bf16.gmra.mrb[36].mxu0 %v3210_v62  ;;  %v5107_v62 = vpop.permute.xlu1 %1723 }
 0x275   :  { %3051 = vmatprep.mubr.msk.bf16.mxu0 %vm2132_vm0, %v3214_v32  ;;  %v5109_v32 = vpop.permute.xlu0 %1728 }
 0x278   :  { %2303 = vmatmul.mubr.bf16.gmra.mrb[40].mxu1 %v3213_v59  ;;  %v5111_v59 = vpop.permute.xlu1 %1733 }
 0x279   :  { %2310 = vmatprep.mubr.bf16.mxu1 %v3217_v9  ;;  %v5113_v9 = vpop.permute.xlu0 %1738 }
 0x27c   :  { %2488 = vmatmul.mubr.bf16.gmra.mrb[40].mxu0 %v3216_v26  ;;  %v5115_v26 = vpop.permute.xlu1 %1743 }
 0x27d   :  { %3052 = vmatprep.mubr.msk.bf16.mxu0 %vm2132_vm0, %v3220_v40  ;;  %v5117_v40 = vpop.permute.xlu0 %1748 }
 0x280   :  { %2311 = vmatmul.mubr.bf16.gmra.mrb[44].mxu1 %v3219_v14  ;;  %v5119_v14 = vpop.permute.xlu1 %1753 }
 0x281   :  { %2318 = vmatprep.mubr.bf16.mxu1 %v3223_v39 }
 0x284   :  { %2496 = vmatmul.mubr.bf16.gmra.mrb[44].mxu0 %v3222_v38 }
 0x285   :  { %3053 = vmatprep.mubr.msk.bf16.mxu0 %vm2132_vm0, %v3226_v7 }
 0x288   :  { %2319 = vmatmul.mubr.bf16.gmra.mrb[48].mxu1 %v3225_v23 }
 0x289   :  { %2326 = vmatprep.mubr.bf16.mxu1 %v3229_v21 }
 0x28c   :  { %2504 = vmatmul.mubr.bf16.gmra.mrb[48].mxu0 %v3228_v48 }
 0x28d   :  { %3054 = vmatprep.mubr.msk.bf16.mxu0 %vm2132_vm0, %v3232_v31  ;;  %v5122_v31 = vpop.permute.xlu0 %1758 }
 0x290   :  { %2327 = vmatmul.mubr.bf16.gmra.mrb[52].mxu1 %v3231_v18 }
 0x291   :  { %2334 = vmatprep.mubr.bf16.mxu1 %v3235_v57 }
 0x294   :  { %2512 = vmatmul.mubr.bf16.gmra.mrb[52].mxu0 %v3234_v63 }
 0x295   :  { %3055 = vmatprep.mubr.msk.bf16.mxu0 %vm2132_vm0, %v3238_v16  ;;  %v5125_v16 = vpop.permute.xlu1 %1763 }
 0x298   :  { %2335 = vmatmul.mubr.bf16.gmra.mrb[56].mxu1 %v3237_v35 }
 0x299   :  { %2342 = vmatprep.mubr.bf16.mxu1 %v3241_v61 }
 0x29c   :  { %2520 = vmatmul.mubr.bf16.gmra.mrb[56].mxu0 %v3240_v3 }
 0x29d   :  { %3056 = vmatprep.mubr.msk.bf16.mxu0 %vm2132_vm0, %v3244_v4 }
 0x2a0   :  { %2343 = vmatmul.mubr.bf16.gmra.mrb[60].mxu1 %v3243_v30 }
 0x2a1   :  { %2350 = vmatprep.mubr.bf16.mxu1 %v3247_v15 }
 0x2a4   :  { %2528 = vmatmul.mubr.bf16.gmra.mrb[60].mxu0 %v3246_v12 }
 0x2a5   :  { %3057 = vmatprep.mubr.msk.bf16.mxu0 %vm2132_vm0, %v3250_v55 }
 0x2a8   :  { %2351 = vmatmul.mubr.bf16.gmra.mrb[64].mxu1 %v3249_v54 }
 0x2a9   :  { %2358 = vmatprep.mubr.bf16.mxu1 %v3253_v45 }
 0x2ac   :  { %2536 = vmatmul.mubr.bf16.gmra.mrb[64].mxu0 %v3252_v10 }
 0x2ad   :  { %3058 = vmatprep.mubr.msk.bf16.mxu0 %vm2132_vm0, %v3256_v24 }
 0x2b0   :  { %2359 = vmatmul.mubr.bf16.gmra.mrb[68].mxu1 %v3255_v8  ;;  %v2682_v8 = vpop.permute.xlu1 %2681 }
 0x2b1   :  { %2366 = vmatprep.mubr.bf16.mxu1 %v3259_v51 }
 0x2b4   :  { %2544 = vmatmul.mubr.bf16.gmra.mrb[68].mxu0 %v3258_v36 }
 0x2b5   :  { %3059 = vmatprep.mubr.msk.bf16.mxu0 %vm2132_vm0, %v3262_v47 }
 0x2b8   :  { %2367 = vmatmul.mubr.bf16.gmra.mrb[72].mxu1 %v3261_v52 }
 0x2bc   :  { %2552 = vmatmul.mubr.bf16.gmra.mrb[72].mxu0 %v3264_v25 }
 0x2fb   :  { %v2224_v39 = vpop.f32.mrb[0].mxu1 }
 0x2fc   :  { %v2226_v38 = vpop.f32.mrb[1].mxu1  ;;  %v2225_v23 = vadd.f32 %v2224_v39, %v4995_v2  ;;  %v2677_v2 = vpop.permute.xlu0 %2676 }
 0x2fd   :  { %v2227_v7 = vpop.f32.mrb[2].mxu1 }
 0x2fe   :  { %v2229_v21 = vpop.f32.mrb[3].mxu1  ;;  %v2228_v18 = vadd.f32 %v2227_v7, %v5007_v44 }
 0x2ff   :  { %v2409_v48 = vpop.f32.mrb[0].mxu0 }
 0x300   :  { %v2410_v57 = vadd.f32 %v2409_v48, %v2225_v23  ;;  %v2411_v63 = vpop.f32.mrb[1].mxu0 }
 0x301   :  { %v2412_v35 = vpop.f32.mrb[2].mxu0 }
 0x302   :  { %v2560_v61 = vmul.f32 0.01, %v2410_v57  ;;  %v2413_v3 = vadd.f32 %v2412_v35, %v2228_v18  ;;  %v2414_v4 = vpop.f32.mrb[3].mxu0  ;;  %v2687_v35 = vpop.permute.xlu0 %2686 }
 0x303   :  { %v2232_v30 = vpop.f32.mrb[4].mxu1 }
 0x304   :  { %v2598_v15 = vmax.f32 %v2410_v57, %v2560_v61  ;;  %v2561_v12 = vmul.f32 0.01, %v2413_v3  ;;  %v2234_v55 = vpop.f32.mrb[5].mxu1  ;;  %v2233_v10 = vadd.f32 %v2232_v30, %v5009_v37 }
 0x305   :  { %v2235_v54 = vpop.f32.mrb[6].mxu1 }
 0x306   :  { %v2599_v45 = vmax.f32 %v2413_v3, %v2561_v12  ;;  %v2237_v24 = vpop.f32.mrb[7].mxu1  ;;  %v2864_v51 = vmul.f32 %v2677_v2, %v2598_v15  ;;  %v2236_v47 = vadd.f32 %v2235_v54, %v5018_v0  ;;  %v2692_v15 = vpop.permute.xlu1 %2691 }
 0x307   :  { %v2417_v44 = vpop.f32.mrb[4].mxu0 }
 0x308   :  { %v2865_v36 = vmul.f32 %v2682_v8, %v2599_v45  ;;  %v2418_v52 = vadd.f32 %v2417_v44, %v2233_v10  ;;  %v2419_v25 = vpop.f32.mrb[5].mxu0 }
 0x309   :  { %v2420_v39 = vpop.f32.mrb[6].mxu0 }
 0x30a   :  { %v2902_v38 = vadd.f32 %v2865_v36, %v2864_v51  ;;  %v2562_v7 = vmul.f32 0.01, %v2418_v52  ;;  %v2421_v23 = vadd.f32 %v2420_v39, %v2236_v47  ;;  %v2422_v21 = vpop.f32.mrb[7].mxu0  ;;  %v2697_v39 = vpop.permute.xlu0 %2696 }
 0x30b   :  { %v2240_v48 = vpop.f32.mrb[8].mxu1 }
 0x30c   :  { %v2600_v18 = vmax.f32 %v2418_v52, %v2562_v7  ;;  %v2563_v57 = vmul.f32 0.01, %v2421_v23  ;;  %v2242_v63 = vpop.f32.mrb[9].mxu1  ;;  %v2241_v4 = vadd.f32 %v2240_v48, %v5023_v49  ;;  %v2702_v48 = vpop.permute.xlu1 %2701 }
 0x30d   :  { %v2243_v37 = vpop.f32.mrb[10].mxu1 }
 0x30e   :  { %v2866_v61 = vmul.f32 %v2687_v35, %v2600_v18  ;;  %v2601_v3 = vmax.f32 %v2421_v23, %v2563_v57  ;;  %v2245_v30 = vpop.f32.mrb[11].mxu1  ;;  %v2244_v54 = vadd.f32 %v2243_v37, %v5035_v42 }
 0x30f   :  { %v2425_v0 = vpop.f32.mrb[8].mxu0 }
 0x310   :  { %v2903_v12 = vadd.f32 %v2902_v38, %v2866_v61  ;;  %v2867_v55 = vmul.f32 %v2692_v15, %v2601_v3  ;;  %v2426_v2 = vadd.f32 %v2425_v0, %v2241_v4  ;;  %v2427_v45 = vpop.f32.mrb[9].mxu0 }
 0x311   :  { %v2428_v10 = vpop.f32.mrb[10].mxu0 }
 0x312   :  { %v2904_v24 = vadd.f32 %v2903_v12, %v2867_v55  ;;  %v2564_v8 = vmul.f32 0.01, %v2426_v2  ;;  %v2429_v44 = vadd.f32 %v2428_v10, %v2244_v54  ;;  %v2430_v51 = vpop.f32.mrb[11].mxu0 }
 0x313   :  { %v2248_v36 = vpop.f32.mrb[12].mxu1 }
 0x314   :  { %v2602_v47 = vmax.f32 %v2426_v2, %v2564_v8  ;;  %v2565_v52 = vmul.f32 0.01, %v2429_v44  ;;  %v2250_v25 = vpop.f32.mrb[13].mxu1  ;;  %v2249_v38 = vadd.f32 %v2248_v36, %v5037_v13  ;;  %v2707_v2 = vpop.permute.xlu0 %2706 }
 0x315   :  { %v2251_v49 = vpop.f32.mrb[14].mxu1 }
 0x316   :  { %v2868_v7 = vmul.f32 %v2697_v39, %v2602_v47  ;;  %v2603_v23 = vmax.f32 %v2429_v44, %v2565_v52  ;;  %v2253_v21 = vpop.f32.mrb[15].mxu1  ;;  %v2252_v63 = vadd.f32 %v2251_v49, %v5045_v46  ;;  %v2712_v44 = vpop.permute.xlu1 %2711 }
 0x317   :  { %v2433_v42 = vpop.f32.mrb[12].mxu0 }
 0x318   :  { %v2905_v18 = vadd.f32 %v2904_v24, %v2868_v7  ;;  %v2869_v57 = vmul.f32 %v2702_v48, %v2603_v23  ;;  %v2434_v35 = vadd.f32 %v2433_v42, %v2249_v38  ;;  %v2435_v37 = vpop.f32.mrb[13].mxu0 }
 0x319   :  { %v2436_v61 = vpop.f32.mrb[14].mxu0 }
 0x31a   :  { %v2906_v3 = vadd.f32 %v2905_v18, %v2869_v57  ;;  %v2566_v4 = vmul.f32 0.01, %v2434_v35  ;;  %v2437_v30 = vadd.f32 %v2436_v61, %v2252_v63  ;;  %v2438_v15 = vpop.f32.mrb[15].mxu0  ;;  %v2717_v57 = vpop.permute.xlu0 %2716 }
 0x31b   :  { %v2256_v0 = vpop.f32.mrb[16].mxu1 }
 0x31c   :  { %v2604_v12 = vmax.f32 %v2434_v35, %v2566_v4  ;;  %v2567_v55 = vmul.f32 0.01, %v2437_v30  ;;  %v2258_v54 = vpop.f32.mrb[17].mxu1  ;;  %v2257_v24 = vadd.f32 %v2256_v0, %v5050_v29 }
 0x31d   :  { %v2259_v13 = vpop.f32.mrb[18].mxu1 }
 0x31e   :  { %v2870_v45 = vmul.f32 %v2707_v2, %v2604_v12  ;;  %v2605_v10 = vmax.f32 %v2437_v30, %v2567_v55  ;;  %v2261_v8 = vpop.f32.mrb[19].mxu1  ;;  %v2260_v47 = vadd.f32 %v2259_v13, %v5062_v43 }
 0x31f   :  { %v2441_v46 = vpop.f32.mrb[16].mxu0 }
 0x320   :  { %v2907_v51 = vadd.f32 %v2906_v3, %v2870_v45  ;;  %v2871_v36 = vmul.f32 %v2712_v44, %v2605_v10  ;;  %v2442_v52 = vadd.f32 %v2441_v46, %v2257_v24  ;;  %v2443_v25 = vpop.f32.mrb[17].mxu0  ;;  %v2722_v3 = vpop.permute.xlu1 %2721 }
 0x321   :  { %v2444_v39 = vpop.f32.mrb[18].mxu0  ;;  %v2727_v46 = vpop.permute.xlu0 %2726 }
 0x322   :  { %v2908_v49 = vadd.f32 %v2907_v51, %v2871_v36  ;;  %v2568_v7 = vmul.f32 0.01, %v2442_v52  ;;  %v2445_v23 = vadd.f32 %v2444_v39, %v2260_v47  ;;  %v2446_v38 = vpop.f32.mrb[19].mxu0 }
 0x323   :  { %v2264_v21 = vpop.f32.mrb[20].mxu1 }
 0x324   :  { %v2606_v48 = vmax.f32 %v2442_v52, %v2568_v7  ;;  %v2569_v42 = vmul.f32 0.01, %v2445_v23  ;;  %v2266_v18 = vpop.f32.mrb[21].mxu1  ;;  %v2265_v37 = vadd.f32 %v2264_v21, %v5064_v41  ;;  %v2732_v25 = vpop.permute.xlu1 %2731 }
 0x325   :  { %v2267_v29 = vpop.f32.mrb[22].mxu1 }
 0x326   :  { %v2872_v63 = vmul.f32 %v2717_v57, %v2606_v48  ;;  %v2607_v35 = vmax.f32 %v2445_v23, %v2569_v42  ;;  %v2269_v61 = vpop.f32.mrb[23].mxu1  ;;  %v2268_v15 = vadd.f32 %v2267_v29, %v5070_v1 }
 0x327   :  { %v2449_v43 = vpop.f32.mrb[20].mxu0  ;;  %v2737_v61 = vpop.permute.xlu0 %2736 }
 0x328   :  { %v2909_v4 = vadd.f32 %v2908_v49, %v2872_v63  ;;  %v2873_v30 = vmul.f32 %v2722_v3, %v2607_v35  ;;  %v2450_v0 = vadd.f32 %v2449_v43, %v2265_v37  ;;  %v2451_v12 = vpop.f32.mrb[21].mxu0 }
 0x329   :  { %v2452_v55 = vpop.f32.mrb[22].mxu0 }
 0x32a   :  { %v2910_v54 = vadd.f32 %v2909_v4, %v2873_v30  ;;  %v2570_v2 = vmul.f32 0.01, %v2450_v0  ;;  %v2453_v13 = vadd.f32 %v2452_v55, %v2268_v15  ;;  %v2454_v45 = vpop.f32.mrb[23].mxu0  ;;  %v2742_v15 = vpop.permute.xlu1 %2741 }
 0x32b   :  { %v2272_v10 = vpop.f32.mrb[24].mxu1 }
 0x32c   :  { %v2608_v24 = vmax.f32 %v2450_v0, %v2570_v2  ;;  %v2571_v8 = vmul.f32 0.01, %v2453_v13  ;;  %v2274_v44 = vpop.f32.mrb[25].mxu1  ;;  %v2273_v47 = vadd.f32 %v2272_v10, %v5075_v27 }
 0x32d   :  { %v2275_v41 = vpop.f32.mrb[26].mxu1 }
 0x32e   :  { %v2874_v51 = vmul.f32 %v2727_v46, %v2608_v24  ;;  %v2609_v36 = vmax.f32 %v2453_v13, %v2571_v8  ;;  %v2277_v52 = vpop.f32.mrb[27].mxu1  ;;  %v2276_v7 = vadd.f32 %v2275_v41, %v5077_v58 }
 0x32f   :  { %v2457_v1 = vpop.f32.mrb[24].mxu0 }
 0x330   :  { %v2911_v39 = vadd.f32 %v2910_v54, %v2874_v51  ;;  %v2875_v49 = vmul.f32 %v2732_v25, %v2609_v36  ;;  %v2458_v23 = vadd.f32 %v2457_v1, %v2273_v47  ;;  %v2459_v38 = vpop.f32.mrb[25].mxu0  ;;  %v2747_v36 = vpop.permute.xlu0 %2746 }
 0x331   :  { %v2460_v21 = vpop.f32.mrb[26].mxu0 }
 0x332   :  { %v2912_v48 = vadd.f32 %v2911_v39, %v2875_v49  ;;  %v2572_v42 = vmul.f32 0.01, %v2458_v23  ;;  %v2461_v18 = vadd.f32 %v2460_v21, %v2276_v7  ;;  %v2462_v57 = vpop.f32.mrb[27].mxu0  ;;  %v2752_v39 = vpop.permute.xlu1 %2751 }
 0x333   :  { %v2280_v29 = vpop.f32.mrb[28].mxu1 }
 0x334   :  { %v2610_v63 = vmax.f32 %v2458_v23, %v2572_v42  ;;  %v2573_v35 = vmul.f32 0.01, %v2461_v18  ;;  %v2282_v37 = vpop.f32.mrb[29].mxu1  ;;  %v2281_v4 = vadd.f32 %v2280_v29, %v5079_v11 }
 0x335   :  { %v2283_v27 = vpop.f32.mrb[30].mxu1 }
 0x336   :  { %v2876_v3 = vmul.f32 %v2737_v61, %v2610_v63  ;;  %v2611_v43 = vmax.f32 %v2461_v18, %v2573_v35  ;;  %v2285_v30 = vpop.f32.mrb[31].mxu1  ;;  %v2284_v55 = vadd.f32 %v2283_v27, %v5081_v17  ;;  %v2757_v27 = vpop.permute.xlu0 %2756 }
 0x337   :  { %v2465_v58 = vpop.f32.mrb[28].mxu0 }
 0x338   :  { %v2913_v0 = vadd.f32 %v2912_v48, %v2876_v3  ;;  %v2877_v12 = vmul.f32 %v2742_v15, %v2611_v43  ;;  %v2466_v54 = vadd.f32 %v2465_v58, %v2281_v4  ;;  %v2467_v2 = vpop.f32.mrb[29].mxu0  ;;  %v2762_v15 = vpop.permute.xlu1 %2761 }
 0x339   :  { %v2468_v13 = vpop.f32.mrb[30].mxu0 }
 0x33a   :  { %v2914_v45 = vadd.f32 %v2913_v0, %v2877_v12  ;;  %v2574_v10 = vmul.f32 0.01, %v2466_v54  ;;  %v2469_v24 = vadd.f32 %v2468_v13, %v2284_v55  ;;  %v2470_v8 = vpop.f32.mrb[31].mxu0 }
 0x33b   :  { %v2288_v44 = vpop.f32.mrb[32].mxu1 }
 0x33c   :  { %v2612_v46 = vmax.f32 %v2466_v54, %v2574_v10  ;;  %v2575_v41 = vmul.f32 0.01, %v2469_v24  ;;  %v2290_v51 = vpop.f32.mrb[33].mxu1  ;;  %v2289_v25 = vadd.f32 %v2288_v44, %v5083_v19 }
 0x33d   :  { %v2291_v11 = vpop.f32.mrb[34].mxu1  ;;  %v2767_v51 = vpop.permute.xlu0 %2766 }
 0x33e   :  { %v2878_v47 = vmul.f32 %v2747_v36, %v2612_v46  ;;  %v2613_v52 = vmax.f32 %v2469_v24, %v2575_v41  ;;  %v2293_v1 = vpop.f32.mrb[35].mxu1  ;;  %v2292_v23 = vadd.f32 %v2291_v11, %v5085_v20 }
 0x33f   :  { %v2473_v17 = vpop.f32.mrb[32].mxu0 }
 0x340   :  { %v2915_v49 = vadd.f32 %v2914_v45, %v2878_v47  ;;  %v2879_v7 = vmul.f32 %v2752_v39, %v2613_v52  ;;  %v2474_v38 = vadd.f32 %v2473_v17, %v2289_v25  ;;  %v2475_v21 = vpop.f32.mrb[33].mxu0  ;;  %v2772_v25 = vpop.permute.xlu1 %2771 }
 0x341   :  { %v2476_v48 = vpop.f32.mrb[34].mxu0 }
 0x342   :  { %v2916_v42 = vadd.f32 %v2915_v49, %v2879_v7  ;;  %v2576_v18 = vmul.f32 0.01, %v2474_v38  ;;  %v2477_v57 = vadd.f32 %v2476_v48, %v2292_v23  ;;  %v2478_v29 = vpop.f32.mrb[35].mxu0 }
 0x343   :  { %v2296_v63 = vpop.f32.mrb[36].mxu1 }
 0x344   :  { %v2614_v35 = vmax.f32 %v2474_v38, %v2576_v18  ;;  %v2577_v37 = vmul.f32 0.01, %v2477_v57  ;;  %v2298_v61 = vpop.f32.mrb[37].mxu1  ;;  %v2297_v4 = vadd.f32 %v2296_v63, %v5087_v22 }
 0x345   :  { %v2299_v19 = vpop.f32.mrb[38].mxu1 }
 0x346   :  { %v2880_v3 = vmul.f32 %v2757_v27, %v2614_v35  ;;  %v2615_v43 = vmax.f32 %v2477_v57, %v2577_v37  ;;  %v2301_v30 = vpop.f32.mrb[39].mxu1  ;;  %v2300_v12 = vadd.f32 %v2299_v19, %v5089_v60  ;;  %v2777_v35 = vpop.permute.xlu0 %2776 }
 0x347   :  { %v2481_v20 = vpop.f32.mrb[36].mxu0 }
 0x348   :  { %v2917_v58 = vadd.f32 %v2916_v42, %v2880_v3  ;;  %v2881_v0 = vmul.f32 %v2762_v15, %v2615_v43  ;;  %v2482_v55 = vadd.f32 %v2481_v20, %v2297_v4  ;;  %v2483_v54 = vpop.f32.mrb[37].mxu0  ;;  %v2782_v3 = vpop.permute.xlu1 %2781 }
 0x349   :  { %v2484_v2 = vpop.f32.mrb[38].mxu0 }
 0x34a   :  { %v2918_v13 = vadd.f32 %v2917_v58, %v2881_v0  ;;  %v2578_v45 = vmul.f32 0.01, %v2482_v55  ;;  %v2485_v10 = vadd.f32 %v2484_v2, %v2300_v12  ;;  %v2486_v24 = vpop.f32.mrb[39].mxu0 }
 0x34b   :  { %v2304_v8 = vpop.f32.mrb[40].mxu1  ;;  %v2787_v24 = vpop.permute.xlu0 %2786 }
 0x34c   :  { %v2616_v44 = vmax.f32 %v2482_v55, %v2578_v45  ;;  %v2579_v46 = vmul.f32 0.01, %v2485_v10  ;;  %v2306_v41 = vpop.f32.mrb[41].mxu1  ;;  %v2305_v47 = vadd.f32 %v2304_v8, %v5091_v53 }
 0x34d   :  { %v2307_v22 = vpop.f32.mrb[42].mxu1 }
 0x34e   :  { %v2882_v36 = vmul.f32 %v2767_v51, %v2616_v44  ;;  %v2617_v11 = vmax.f32 %v2485_v10, %v2579_v46  ;;  %v2309_v52 = vpop.f32.mrb[43].mxu1  ;;  %v2308_v17 = vadd.f32 %v2307_v22, %v5093_v28  ;;  %v2792_v51 = vpop.permute.xlu1 %2791 }
 0x34f   :  { %v2489_v60 = vpop.f32.mrb[40].mxu0 }
 0x350   :  { %v2919_v1 = vadd.f32 %v2918_v13, %v2882_v36  ;;  %v2883_v39 = vmul.f32 %v2772_v25, %v2617_v11  ;;  %v2490_v49 = vadd.f32 %v2489_v60, %v2305_v47  ;;  %v2491_v7 = vpop.f32.mrb[41].mxu0 }
 0x351   :  { %v2492_v23 = vpop.f32.mrb[42].mxu0 }
 0x352   :  { %v2920_v38 = vadd.f32 %v2919_v1, %v2883_v39  ;;  %v2580_v21 = vmul.f32 0.01, %v2490_v49  ;;  %v2493_v48 = vadd.f32 %v2492_v23, %v2308_v17  ;;  %v2494_v42 = vpop.f32.mrb[43].mxu0 }
 0x353   :  { %v2312_v18 = vpop.f32.mrb[44].mxu1 }
 0x354   :  { %v2618_v57 = vmax.f32 %v2490_v49, %v2580_v21  ;;  %v2581_v29 = vmul.f32 0.01, %v2493_v48  ;;  %v2314_v63 = vpop.f32.mrb[45].mxu1  ;;  %v2313_v27 = vadd.f32 %v2312_v18, %v5095_v56  ;;  %v2797_v21 = vpop.permute.xlu0 %2796 }
 0x355   :  { %v2315_v53 = vpop.f32.mrb[46].mxu1 }
 0x356   :  { %v2884_v37 = vmul.f32 %v2777_v35, %v2618_v57  ;;  %v2619_v61 = vmax.f32 %v2493_v48, %v2581_v29  ;;  %v2317_v19 = vpop.f32.mrb[47].mxu1  ;;  %v2316_v30 = vadd.f32 %v2315_v53, %v5097_v50  ;;  %v2802_v29 = vpop.permute.xlu1 %2801 }
 0x357   :  { %v2497_v28 = vpop.f32.mrb[44].mxu0 }
 0x358   :  { %v2921_v43 = vadd.f32 %v2920_v38, %v2884_v37  ;;  %v2885_v4 = vmul.f32 %v2782_v3, %v2619_v61  ;;  %v2498_v15 = vadd.f32 %v2497_v28, %v2313_v27  ;;  %v2499_v20 = vpop.f32.mrb[45].mxu0 }
 0x359   :  { %v2500_v58 = vpop.f32.mrb[46].mxu0 }
 0x35a   :  { %v2922_v0 = vadd.f32 %v2921_v43, %v2885_v4  ;;  %v2582_v12 = vmul.f32 0.01, %v2498_v15  ;;  %v2501_v55 = vadd.f32 %v2500_v58, %v2316_v30  ;;  %v2502_v54 = vpop.f32.mrb[47].mxu0  ;;  %v2807_v58 = vpop.permute.xlu0 %2806 }
 0x35b   :  { %v2320_v2 = vpop.f32.mrb[48].mxu1 }
 0x35c   :  { %v2620_v13 = vmax.f32 %v2498_v15, %v2582_v12  ;;  %v2583_v45 = vmul.f32 0.01, %v2501_v55  ;;  %v2322_v10 = vpop.f32.mrb[49].mxu1  ;;  %v2321_v46 = vadd.f32 %v2320_v2, %v5099_v6  ;;  %v2812_v2 = vpop.permute.xlu1 %2811 }
 0x35d   :  { %v2323_v56 = vpop.f32.mrb[50].mxu1 }
 0x35e   :  { %v2886_v8 = vmul.f32 %v2787_v24, %v2620_v13  ;;  %v2621_v44 = vmax.f32 %v2501_v55, %v2583_v45  ;;  %v2325_v41 = vpop.f32.mrb[51].mxu1  ;;  %v2324_v11 = vadd.f32 %v2323_v56, %v5101_v34 }
 0x35f   :  { %v2505_v50 = vpop.f32.mrb[48].mxu0 }
 0x360   :  { %v2923_v22 = vadd.f32 %v2922_v0, %v2886_v8  ;;  %v2887_v36 = vmul.f32 %v2792_v51, %v2621_v44  ;;  %v2506_v47 = vadd.f32 %v2505_v50, %v2321_v46  ;;  %v2507_v52 = vpop.f32.mrb[49].mxu0 }
 0x361   :  { %v2508_v25 = vpop.f32.mrb[50].mxu0 }
 0x362   :  { %v2924_v60 = vadd.f32 %v2923_v22, %v2887_v36  ;;  %v2584_v1 = vmul.f32 0.01, %v2506_v47  ;;  %v2509_v39 = vadd.f32 %v2508_v25, %v2324_v11  ;;  %v2510_v17 = vpop.f32.mrb[51].mxu0  ;;  %v2817_v22 = vpop.permute.xlu0 %2816 }
 0x363   :  { %v2328_v49 = vpop.f32.mrb[52].mxu1 }
 0x364   :  { %v2622_v7 = vmax.f32 %v2506_v47, %v2584_v1  ;;  %v2585_v23 = vmul.f32 0.01, %v2509_v39  ;;  %v2330_v38 = vpop.f32.mrb[53].mxu1  ;;  %v2329_v18 = vadd.f32 %v2328_v49, %v5103_v33 }
 0x365   :  { %v2331_v6 = vpop.f32.mrb[54].mxu1 }
 0x366   :  { %v2888_v48 = vmul.f32 %v2797_v21, %v2622_v7  ;;  %v2623_v42 = vmax.f32 %v2509_v39, %v2585_v23  ;;  %v2333_v57 = vpop.f32.mrb[55].mxu1  ;;  %v2332_v53 = vadd.f32 %v2331_v6, %v5105_v5  ;;  %v2822_v39 = vpop.permute.xlu1 %2821 }
 0x367   :  { %v2513_v34 = vpop.f32.mrb[52].mxu0  ;;  %v2827_v6 = vpop.permute.xlu0 %2826 }
 0x368   :  { %v2925_v63 = vadd.f32 %v2924_v60, %v2888_v48  ;;  %v2889_v35 = vmul.f32 %v2802_v29, %v2623_v42  ;;  %v2514_v37 = vadd.f32 %v2513_v34, %v2329_v18  ;;  %v2515_v61 = vpop.f32.mrb[53].mxu0 }
 0x369   :  { %v2516_v27 = vpop.f32.mrb[54].mxu0 }
 0x36a   :  { %v2926_v19 = vadd.f32 %v2925_v63, %v2889_v35  ;;  %v2586_v3 = vmul.f32 0.01, %v2514_v37  ;;  %v2517_v28 = vadd.f32 %v2516_v27, %v2332_v53  ;;  %v2518_v43 = vpop.f32.mrb[55].mxu0 }
 0x36b   :  { %v2336_v4 = vpop.f32.mrb[56].mxu1 }
 0x36c   :  { %v2624_v30 = vmax.f32 %v2514_v37, %v2586_v3  ;;  %v2587_v15 = vmul.f32 0.01, %v2517_v28  ;;  %v2338_v20 = vpop.f32.mrb[57].mxu1  ;;  %v2337_v55 = vadd.f32 %v2336_v4, %v5107_v62  ;;  %v2837_v3 = vpop.permute.xlu0 %2836 }
 0x36d   :  { %v2339_v33 = vpop.f32.mrb[58].mxu1 }
 0x36e   :  { %v2890_v0 = vmul.f32 %v2807_v58, %v2624_v30  ;;  %v2625_v12 = vmax.f32 %v2517_v28, %v2587_v15  ;;  %v2341_v54 = vpop.f32.mrb[59].mxu1  ;;  %v2340_v10 = vadd.f32 %v2339_v33, %v5109_v32 }
 0x36f   :  { %v2521_v5 = vpop.f32.mrb[56].mxu0 }
 0x370   :  { %v2927_v13 = vadd.f32 %v2926_v19, %v2890_v0  ;;  %v2891_v45 = vmul.f32 %v2812_v2, %v2625_v12  ;;  %v2522_v24 = vadd.f32 %v2521_v5, %v2337_v55  ;;  %v2523_v56 = vpop.f32.mrb[57].mxu0  ;;  %v2832_v19 = vpop.permute.xlu1 %2831 }
 0x371   :  { %v2524_v8 = vpop.f32.mrb[58].mxu0 }
 0x372   :  { %v2928_v44 = vadd.f32 %v2927_v13, %v2891_v45  ;;  %v2588_v46 = vmul.f32 0.01, %v2522_v24  ;;  %v2525_v41 = vadd.f32 %v2524_v8, %v2340_v10  ;;  %v2526_v51 = vpop.f32.mrb[59].mxu0  ;;  %v2842_v13 = vpop.permute.xlu0 %2841 }
 0x373   :  { %v2344_v50 = vpop.f32.mrb[60].mxu1 }
 0x374   :  { %v2626_v36 = vmax.f32 %v2522_v24, %v2588_v46  ;;  %v2589_v11 = vmul.f32 0.01, %v2525_v41  ;;  %v2346_v47 = vpop.f32.mrb[61].mxu1  ;;  %v2345_v60 = vadd.f32 %v2344_v50, %v5111_v59  ;;  %v1769_v8 = vpop.permute.xlu1 %1768 }
 0x375   :  { %v2347_v62 = vpop.f32.mrb[62].mxu1 }
 0x376   :  { %v2892_v52 = vmul.f32 %v2817_v22, %v2626_v36  ;;  %v2627_v25 = vmax.f32 %v2525_v41, %v2589_v11  ;;  %v2349_v1 = vpop.f32.mrb[63].mxu1  ;;  %v2348_v7 = vadd.f32 %v2347_v62, %v5113_v9 }
 0x377   :  { %v2529_v32 = vpop.f32.mrb[60].mxu0 }
 0x378   :  { %v2929_v17 = vadd.f32 %v2928_v44, %v2892_v52  ;;  %v2893_v49 = vmul.f32 %v2822_v39, %v2627_v25  ;;  %v2530_v23 = vadd.f32 %v2529_v32, %v2345_v60  ;;  %v2531_v38 = vpop.f32.mrb[61].mxu0  ;;  %v2847_v39 = vpop.permute.xlu1 %2846 }
 0x379   :  { %v2532_v21 = vpop.f32.mrb[62].mxu0 }
 0x37a   :  { %v2930_v48 = vadd.f32 %v2929_v17, %v2893_v49  ;;  %v2590_v42 = vmul.f32 0.01, %v2530_v23  ;;  %v2533_v18 = vadd.f32 %v2532_v21, %v2348_v7  ;;  %v2534_v57 = vpop.f32.mrb[63].mxu0 }
 0x37b   :  { %v2352_v29 = vpop.f32.mrb[64].mxu1 }
 0x37c   :  { %v2628_v34 = vmax.f32 %v2530_v23, %v2590_v42  ;;  %v2591_v63 = vmul.f32 0.01, %v2533_v18  ;;  %v2354_v35 = vpop.f32.mrb[65].mxu1  ;;  %v2353_v61 = vadd.f32 %v2352_v29, %v5115_v26  ;;  %v2852_v23 = vpop.permute.xlu0 %2851 }
 0x37d   :  { %v2355_v59 = vpop.f32.mrb[66].mxu1 }
 0x37e   :  { %v2894_v53 = vmul.f32 %v2827_v6, %v2628_v34  ;;  %v2629_v37 = vmax.f32 %v2533_v18, %v2591_v63  ;;  %v2357_v27 = vpop.f32.mrb[67].mxu1  ;;  %v2356_v4 = vadd.f32 %v2355_v59, %v5117_v40 }
 0x37f   :  { %v2537_v9 = vpop.f32.mrb[64].mxu0 }
 0x380   :  { %v2931_v28 = vadd.f32 %v2930_v48, %v2894_v53  ;;  %v2895_v43 = vmul.f32 %v2832_v19, %v2629_v37  ;;  %v2538_v30 = vadd.f32 %v2537_v9, %v2353_v61  ;;  %v2539_v15 = vpop.f32.mrb[65].mxu0  ;;  %v2857_v53 = vpop.permute.xlu1 %2856 }
 0x381   :  { %v2540_v20 = vpop.f32.mrb[66].mxu0  ;;  %v2862_v27 = vpop.permute.xlu0 %2861 }
 0x382   :  { %v2932_v58 = vadd.f32 %v2931_v28, %v2895_v43  ;;  %v2592_v33 = vmul.f32 0.01, %v2538_v30  ;;  %v2541_v0 = vadd.f32 %v2540_v20, %v2356_v4  ;;  %v2542_v12 = vpop.f32.mrb[67].mxu0  ;;  %v2948_v20 = vstv %s5183_s6 }
 0x383   :  { %v2360_v55 = vpop.f32.mrb[68].mxu1 }
 0x384   :  { %v2630_v54 = vmax.f32 %v2538_v30, %v2592_v33  ;;  %v2593_v2 = vmul.f32 0.01, %v2541_v0  ;;  %v2362_v5 = vpop.f32.mrb[69].mxu1  ;;  %v2361_v24 = vadd.f32 %v2360_v55, %v5119_v14 }
 0x385   :  { %v2363_v26 = vpop.f32.mrb[70].mxu1 }
 0x386   :  { %v2896_v45 = vmul.f32 %v2837_v3, %v2630_v54  ;;  %v2631_v10 = vmax.f32 %v2541_v0, %v2593_v2  ;;  %v2365_v56 = vpop.f32.mrb[71].mxu1  ;;  %v2364_v41 = vadd.f32 %v2363_v26, %v5122_v31 }
 0x387   :  { %v2545_v40 = vpop.f32.mrb[68].mxu0 }
 0x388   :  { %v2933_v44 = vadd.f32 %v2932_v58, %v2896_v45  ;;  %v2897_v46 = vmul.f32 %v2842_v13, %v2631_v10  ;;  %v2546_v51 = vadd.f32 %v2545_v40, %v2361_v24  ;;  %v2547_v50 = vpop.f32.mrb[69].mxu0 }
 0x389   :  { %v2548_v22 = vpop.f32.mrb[70].mxu0 }
 0x38a   :  { %v2934_v36 = vadd.f32 %v2933_v44, %v2897_v46  ;;  %v2594_v11 = vmul.f32 0.01, %v2546_v51  ;;  %v2549_v47 = vadd.f32 %v2548_v22, %v2364_v41  ;;  %v2550_v62 = vpop.f32.mrb[71].mxu0 }
 0x38b   :  { %v2368_v52 = vpop.f32.mrb[72].mxu1 }
 0x38c   :  { %v2632_v25 = vmax.f32 %v2546_v51, %v2594_v11  ;;  %v2595_v60 = vmul.f32 0.01, %v2549_v47  ;;  %v2370_v1 = vpop.f32.mrb[73].mxu1  ;;  %v2369_v49 = vadd.f32 %v2368_v52, %v5125_v16 }
 0x38d   :  { %v2371_v14 = vpop.f32.mrb[74].mxu1 }
 0x38e   :  { %v2898_v32 = vmul.f32 %v2847_v39, %v2632_v25  ;;  %v2633_v17 = vmax.f32 %v2549_v47, %v2595_v60  ;;  %v2373_v7 = vpop.f32.mrb[75].mxu1  ;;  %v2372_v6 = vadd.f32 %v2371_v14, %v1769_v8 }
 0x38f   :  { %v2553_v31 = vpop.f32.mrb[72].mxu0 }
 0x390   :  { %v2935_v38 = vadd.f32 %v2934_v36, %v2898_v32  ;;  %v2899_v21 = vmul.f32 %v2852_v23, %v2633_v17  ;;  %v2554_v48 = vadd.f32 %v2553_v31, %v2369_v49  ;;  %v2555_v42 = vpop.f32.mrb[73].mxu0 }
 0x391   :  { %v2556_v18 = vpop.f32.mrb[74].mxu0 }
 0x392   :  { %v2936_v57 = vadd.f32 %v2935_v38, %v2899_v21  ;;  %v2596_v29 = vmul.f32 0.01, %v2554_v48  ;;  %v2557_v34 = vadd.f32 %v2556_v18, %v2372_v6  ;;  %v2558_v63 = vpop.f32.mrb[75].mxu0 }
 0x394   :  { %v2634_v35 = vmax.f32 %v2554_v48, %v2596_v29  ;;  %v2597_v59 = vmul.f32 0.01, %v2557_v34 }
 0x396   :  { %v2900_v37 = vmul.f32 %v2857_v53, %v2634_v35  ;;  %v2635_v61 = vmax.f32 %v2557_v34, %v2597_v59 }
 0x398   :  { %v2937_v16 = vadd.f32 %v2936_v57, %v2900_v37  ;;  %v2901_v19 = vmul.f32 %v2862_v27, %v2635_v61 }
 0x39a   :  { %v2939_v9 = vsel %vm2938_vm1, %v2901_v19, 0.0 }
 0x39b   :  { %v2940_v3 = vadd.f32 %v2939_v9, %v2937_v16 }
 0x39d   :  { %v2941_v28 = vrot.slane %v2940_v3, 4 }
 0x39f   :  { %v2942_v43 = vadd.f32 %v2941_v28, %v2940_v3 }
 0x3a1   :  { %v2943_v4 = vrot.slane %v2942_v43, 2 }
 0x3a3   :  { %v2944_v30 = vadd.f32 %v2943_v4, %v2942_v43 }
 0x3a5   :  { %v2945_v15 = vrot.slane %v2944_v30, 1 }
 0x3a7   :  { %v2946_v58 = vadd.f32 %v2945_v15, %v2944_v30 }
 0x3a9   :  { %v2949_v33 = vadd.f32 %v2948_v20, %v2946_v58 }
 0x3ab   :  { %2950 = vst [vmem:[#allocation3] sm:$0x1] %v2949_v33 }
 0x3ac   :  { %3276 = shalt.err (!%p3273_p4)
}
 0x3ad   :  { %s3277_s27 = scalar_lea.hbm %s5184_s7, 16 }
 0x3ae   :  { %p3278_p5 = scmp.ne.s32.totalorder %s5184_s7, %s3277_s27  ;;  %p3281_p6 = scmp.lt.u32.totalorder %s3277_s27, %s5184_s7 }
 0x3b0   :  { %p3283_p7 = pnand %p3281_p6, %p3278_p5 }
 0x3b2   :  { %3286 = shalt.err (!%p3283_p7)
}
 0x3b3   :  { %2960 = dma.vmem_to_hbm [thread:$0]  %s2958_s0, 16, %s5184_s7, [#allocation4]  }
 0x3b4   :  { %3287 = dma.done.wait [#allocation4], 16  }
 0x3b5   :  { %3288 = vsyncadd [#allocation4], 4294967280 }
 0x3b6   :  { %2964 = vsyncpa [#allocation4], 1 }

</bundles_post_ra>
